<compile_context>
chip_gen: v6e
topology: v6e:2x2x1
jax: 0.10.0
libtpu: 0.0.40
codegen_flags: <defaults>
</compile_context>

<pallas_src>
import math
import jax
import jax.numpy as jnp
from jax import lax
from jax.experimental import pallas as pl
from jax.experimental.pallas import tpu as pltpu

# ---------------- configuration (small shapes) ----------------
B, S = 2, 8                 # batch, sequence length
FEATURE_DIM = 32            # input feature dim
D_MODEL = 32                # transformer model dim
NHEAD = 4                   # attention heads
DH = D_MODEL // NHEAD       # head dim
NUM_LAYERS = 2              # encoder layers
D_FF = 4 * D_MODEL          # feedforward dim (= 128, exactly one lane tile)
D_HALF = D_MODEL // 2       # score-predictor hidden dim
LN_EPS = 1e-5
BS = B * S                  # flattened batch*seq rows
MISC_ROWS = 88              # packed misc slab rows (multiple of 8)


# ---------------- shared math helpers (used by kernel and reference) ----------------
def _layernorm(x, w, b, eps=LN_EPS):
    mu = jnp.mean(x, axis=-1, keepdims=True)
    var = jnp.mean((x - mu) ** 2, axis=-1, keepdims=True)
    return (x - mu) * jax.lax.rsqrt(var + eps) * w + b


# ---------------- the single fused kernel ----------------
def fused_forward_kernel(feats_ref, wqkv_ref, wo_ref, w1_ref, w2_ref,
                         lvec_ref, misc_ref, out_ref):
    f32 = jnp.float32

    # ---- unpack the misc slab (loaded once; static value slices are free-ish) ----
    misc = misc_ref[...]                                   # (88, 128)
    wproj = misc[0:D_MODEL, 0:D_MODEL]                     # (32, 32)
    pebias = misc[D_MODEL:D_MODEL + BS, 0:D_MODEL]         # (16, 32)  PE + proj bias
    sw1 = misc[48:48 + D_MODEL, 0:D_HALF]                  # (32, 16)
    sb1 = misc[80:81, 0:D_HALF]                            # (1, 16)
    sw2r = misc[81:82, 0:D_HALF]                           # (1, 16)   score w2 as a row
    sb2 = misc[82:83, 0:1]                                 # (1, 1)

    # ---- feature projection + positional encoding (proj bias folded into pebias) ----
    x = jnp.dot(feats_ref[...], wproj, preferred_element_type=f32) + pebias   # (16, 32)

    scale = 1.0 / math.sqrt(DH)
    for l in range(NUM_LAYERS):                            # static unroll (tiny)
        lv = lvec_ref[l]                                   # (8, 128) packed per-layer vecs
        bqkv = lv[0:1, :3 * D_MODEL]
        bo = lv[1:2, :D_MODEL]
        ln1w, ln1b = lv[2:3, :D_MODEL], lv[3:4, :D_MODEL]
        b1 = lv[4:5, :]                                    # D_FF == 128
        b2 = lv[5:6, :D_MODEL]
        ln2w, ln2b = lv[6:7, :D_MODEL], lv[7:8, :D_MODEL]

        # --- fused QKV projection: one (16,32)x(32,96) matmul ---
        qkv = jnp.dot(x, wqkv_ref[l], preferred_element_type=f32) + bqkv      # (16, 96)

        # --- attention scores for all (b,h), no transposes (contract over DH) ---
        s_tiles = []
        for b in range(B):
            for h in range(NHEAD):
                q_bh = qkv[b * S:(b + 1) * S, h * DH:(h + 1) * DH]
                k_bh = qkv[b * S:(b + 1) * S, D_MODEL + h * DH:D_MODEL + (h + 1) * DH]
                s_tiles.append(lax.dot_general(
                    q_bh, k_bh, (((1,), (1,)), ((), ())),
                    preferred_element_type=f32))                              # (S, S)
        s = jnp.concatenate(s_tiles, axis=0) * scale                          # (64, 8)

        # --- batched softmax: one max / exp / sum / divide per layer (exact div) ---
        s = s - jnp.max(s, axis=-1, keepdims=True)
        p = jnp.exp(s)
        p = p / jnp.sum(p, axis=-1, keepdims=True)

        # --- PV matmuls, lane-packed head assembly, single full-width out-proj ---
        rows = []
        for b in range(B):
            head_o = []
            for h in range(NHEAD):
                idx = (b * NHEAD + h) * S
                p_bh = p[idx:idx + S, :]                                      # (S, S)
                v_bh = qkv[b * S:(b + 1) * S,
                           2 * D_MODEL + h * DH:2 * D_MODEL + (h + 1) * DH]  # (S, DH)
                head_o.append(jnp.dot(p_bh, v_bh, preferred_element_type=f32))
            rows.append(jnp.concatenate(head_o, axis=1))                      # (S, D) lanes
        o_slab = jnp.concatenate(rows, axis=0)                                # (16, 32)
        attn = jnp.dot(o_slab, wo_ref[l], preferred_element_type=f32) + bo    # (16, 32)

        # --- residual + LN1, FFN (ReLU), residual + LN2 (post-norm, dropout=identity) ---
        h1 = _layernorm(x + attn, ln1w, ln1b)
        ff = jnp.dot(h1, w1_ref[l], preferred_element_type=f32) + b1
        ff = jnp.maximum(ff, 0.0)
        ff = jnp.dot(ff, w2_ref[l], preferred_element_type=f32) + b2
        x = _layernorm(h1 + ff, ln2w, ln2b)

    # ---- score predictor: Linear -> ReLU -> Linear -> Sigmoid, lane-dense (1, B*S) ----
    hs = jnp.dot(x, sw1, preferred_element_type=f32) + sb1
    hs = jnp.maximum(hs, 0.0)                                                 # (16, 16)
    logits = lax.dot_general(sw2r, hs, (((1,), (1,)), ((), ())),
                             preferred_element_type=f32) + sb2                # (1, 16)
    out_ref[...] = jax.nn.sigmoid(logits).astype(out_ref.dtype)


def fused_forward(feats, fp):
    """Single pallas_call for the whole forward pass. Returns (B, S) scores."""
    out = pl.pallas_call(
        fused_forward_kernel,
        out_shape=jax.ShapeDtypeStruct((1, BS), jnp.float32),
        grid=(1,),
        in_specs=[
            pl.BlockSpec((BS, FEATURE_DIM), lambda i: (0, 0)),                        # feats
            pl.BlockSpec((NUM_LAYERS, D_MODEL, 3 * D_MODEL), lambda i: (0, 0, 0)),    # wqkv
            pl.BlockSpec((NUM_LAYERS, D_MODEL, D_MODEL), lambda i: (0, 0, 0)),        # wo
            pl.BlockSpec((NUM_LAYERS, D_MODEL, D_FF), lambda i: (0, 0, 0)),           # w1
            pl.BlockSpec((NUM_LAYERS, D_FF, D_MODEL), lambda i: (0, 0, 0)),           # w2
            pl.BlockSpec((NUM_LAYERS, 8, 128), lambda i: (0, 0, 0)),                  # lvec
            pl.BlockSpec((MISC_ROWS, 128), lambda i: (0, 0)),                         # misc
        ],
        out_specs=pl.BlockSpec((1, BS), lambda i: (0, 0)),
        compiler_params=pltpu.CompilerParams(dimension_semantics=("arbitrary",)),
    )(feats.reshape(BS, FEATURE_DIM),
      fp["wqkv"], fp["wo"], fp["w1"], fp["w2"], fp["lvec"], fp["misc"])
    return out.reshape(B, S)


# ---------------- one-time parameter restructuring for the fused kernel ----------------
def prepare_fused_params(params, pe):
    """Repack PyTorch-layout params: per-layer weight slabs, tiny per-layer vectors in
    one (NUM_LAYERS, 8, 128) slab, and wproj / PE(+proj bias) / score weights in one
    (88, 128) misc slab -> 7 kernel inputs total."""
    def pad_lanes(v, width=128):
        return jnp.pad(v, ((0, 0), (0, width - v.shape[1])))

    wqkv, wo, w1, w2, lvec = [], [], [], [], []
    for p in params["layers"]:
        wqkv.append(p["wqkv"])                                 # (32, 96)
        wo.append(p["wo"])                                     # (32, 32)
        w1.append(p["w1"])                                     # (32, 128)
        w2.append(p["w2"])                                     # (128, 32)
        lvec.append(jnp.concatenate([
            pad_lanes(p["bqkv"]),      # row 0 : fused QKV bias (96 wide)
            pad_lanes(p["bo"]),        # row 1
            pad_lanes(p["ln1w"]),      # row 2
            pad_lanes(p["ln1b"]),      # row 3
            pad_lanes(p["b1"]),        # row 4 (128 wide)
            pad_lanes(p["b2"]),        # row 5
            pad_lanes(p["ln2w"]),      # row 6
            pad_lanes(p["ln2b"]),      # row 7
        ], axis=0))                                            # (8, 128)

    sp = params["score"]
    pebias = jnp.tile(pe, (B, 1)) + params["bproj"]            # (B*S, D): PE + proj bias
    misc = jnp.concatenate([
        pad_lanes(params["wproj"]),                            # rows  0..31
        pad_lanes(pebias),                                     # rows 32..47
        pad_lanes(sp["w1"]),                                   # rows 48..79
        pad_lanes(sp["b1"]),                                   # row  80
        pad_lanes(sp["w2"].T),                                 # row  81
        pad_lanes(sp["b2"]),                                   # row  82
        jnp.zeros((MISC_ROWS - 83, 128), jnp.float32),         # pad to 88 rows
    ], axis=0)

    return {
        "wqkv": jnp.stack(wqkv, axis=0),                       # (L, 32, 96)
        "wo": jnp.stack(wo, axis=0),                           # (L, 32, 32)
        "w1": jnp.stack(w1, axis=0),                           # (L, 32, 128)
        "w2": jnp.stack(w2, axis=0),                           # (L, 128, 32)
        "lvec": jnp.stack(lvec, axis=0),                       # (L, 8, 128)
        "misc": misc,                                          # (88, 128)
    }


# ---------------- parameter init (deterministic, xavier-uniform like) ----------------
def xavier(key, shape):
    fan_in, fan_out = shape
    limit = math.sqrt(6.0 / (fan_in + fan_out))
    return jax.random.uniform(key, shape, jnp.float32, -limit, limit)


def init_params(key):
    keys = jax.random.split(key, 4 + 4 * NUM_LAYERS)
    ki = iter(keys)
    params = {
        "wproj": xavier(next(ki), (FEATURE_DIM, D_MODEL)),
        "bproj": jnp.zeros((1, D_MODEL), jnp.float32),
        "layers": [],
        "score": {
            "w1": xavier(next(ki), (D_MODEL, D_HALF)),
            "b1": jnp.zeros((1, D_HALF), jnp.float32),
            "w2": xavier(next(ki), (D_HALF, 1)),
            "b2": jnp.zeros((1, 1), jnp.float32),
        },
    }
    next(ki)  # spare key (keeps split count fixed)
    for _ in range(NUM_LAYERS):
        params["layers"].append({
            "wqkv": xavier(next(ki), (D_MODEL, 3 * D_MODEL)),
            "bqkv": jnp.zeros((1, 3 * D_MODEL), jnp.float32),
            "wo": xavier(next(ki), (D_MODEL, D_MODEL)),
            "bo": jnp.zeros((1, D_MODEL), jnp.float32),
            "ln1w": jnp.ones((1, D_MODEL), jnp.float32),
            "ln1b": jnp.zeros((1, D_MODEL), jnp.float32),
            "w1": xavier(next(ki), (D_MODEL, D_FF)),
            "b1": jnp.zeros((1, D_FF), jnp.float32),
            "w2": xavier(next(ki), (D_FF, D_MODEL)),
            "b2": jnp.zeros((1, D_MODEL), jnp.float32),
            "ln2w": jnp.ones((1, D_MODEL), jnp.float32),
            "ln2b": jnp.zeros((1, D_MODEL), jnp.float32),
        })
    return params


def make_positional_encoding(seq_len, d_model):
    pos = jnp.arange(seq_len, dtype=jnp.float32)[:, None]
    div = jnp.exp(jnp.arange(0, d_model, 2, dtype=jnp.float32)
                  * (-math.log(10000.0) / d_model))
    pe = jnp.zeros((seq_len, d_model), jnp.float32)
    pe = pe.at[:, 0::2].set(jnp.sin(pos * div))
    pe = pe.at[:, 1::2].set(jnp.cos(pos * div))
    return pe


# ---------------- pure-JAX reference (PyTorch-faithful math) ----------------
def forward_ref(feats, params, pe):
    x = feats @ params["wproj"] + params["bproj"] + pe
    for p in params["layers"]:
        qkv = x @ p["wqkv"] + p["bqkv"]
        q, k, v = qkv[..., :D_MODEL], qkv[..., D_MODEL:2 * D_MODEL], qkv[..., 2 * D_MODEL:]
        q = q.reshape(B, S, NHEAD, DH).transpose(0, 2, 1, 3)
        k = k.reshape(B, S, NHEAD, DH).transpose(0, 2, 1, 3)
        v = v.reshape(B, S, NHEAD, DH).transpose(0, 2, 1, 3)
        s = jnp.einsum("bhqd,bhkd->bhqk", q, k) / math.sqrt(DH)
        a = jax.nn.softmax(s, axis=-1)
        o = jnp.einsum("bhqk,bhkd->bhqd", a, v).transpose(0, 2, 1, 3).reshape(B, S, D_MODEL)
        o = o @ p["wo"] + p["bo"]
        x = _layernorm(x + o, p["ln1w"], p["ln1b"])
        f = jnp.maximum(x @ p["w1"] + p["b1"], 0.0) @ p["w2"] + p["b2"]
        x = _layernorm(x + f, p["ln2w"], p["ln2b"])
    sp = params["score"]
    h = jnp.maximum(x @ sp["w1"] + sp["b1"], 0.0)
    return jax.nn.sigmoid(h @ sp["w2"] + sp["b2"])[..., 0]


if __name__ == "__main__":
    key = jax.random.PRNGKey(0)
    k_param, k_feat = jax.random.split(key)
    params = init_params(k_param)
    pe = make_positional_encoding(S, D_MODEL)
    feats = jax.random.normal(k_feat, (B, S, FEATURE_DIM), jnp.float32)

    fused = prepare_fused_params(params, pe)        # one-time weight repacking
    scores = jax.block_until_ready(fused_forward(feats, fused))
    assert scores.shape == (B, S), scores.shape

    ref = jax.block_until_ready(forward_ref(feats, params, pe))
    assert jnp.allclose(scores, ref, atol=1e-4, rtol=1e-4), (
        float(jnp.max(jnp.abs(scores - ref))))

    print("KERNEL_OK")
</pallas_src>

<mosaic_0001>
module attributes {stable_mosaic.version = 11 : i64} {
  func.func @fused_forward_kernel(%arg0: i32, %arg1: memref<16x32xf32, #tpu.memory_space<vmem>>, %arg2: memref<2x32x96xf32, #tpu.memory_space<vmem>>, %arg3: memref<2x32x32xf32, #tpu.memory_space<vmem>>, %arg4: memref<2x32x128xf32, #tpu.memory_space<vmem>>, %arg5: memref<2x128x32xf32, #tpu.memory_space<vmem>>, %arg6: memref<2x8x128xf32, #tpu.memory_space<vmem>>, %arg7: memref<88x128xf32, #tpu.memory_space<vmem>>, %arg8: memref<1x16xf32, #tpu.memory_space<vmem>>) attributes {dimension_semantics = [#tpu.dimension_semantics<arbitrary>], iteration_bounds = array<i64: 1>, scalar_prefetch = 0 : i64, scratch_operands = 0 : i64, tpu.core_type = #tpu.core_type<tc>, window_params = [{pipeline_mode = #tpu.pipeline_mode<synchronous>, transform_indices = @transform_0, window_bounds = array<i64: 16, 32>}, {pipeline_mode = #tpu.pipeline_mode<synchronous>, transform_indices = @transform_1, window_bounds = array<i64: 2, 32, 96>}, {pipeline_mode = #tpu.pipeline_mode<synchronous>, transform_indices = @transform_2, window_bounds = array<i64: 2, 32, 32>}, {pipeline_mode = #tpu.pipeline_mode<synchronous>, transform_indices = @transform_3, window_bounds = array<i64: 2, 32, 128>}, {pipeline_mode = #tpu.pipeline_mode<synchronous>, transform_indices = @transform_4, window_bounds = array<i64: 2, 128, 32>}, {pipeline_mode = #tpu.pipeline_mode<synchronous>, transform_indices = @transform_5, window_bounds = array<i64: 2, 8, 128>}, {pipeline_mode = #tpu.pipeline_mode<synchronous>, transform_indices = @transform_6, window_bounds = array<i64: 88, 128>}, {pipeline_mode = #tpu.pipeline_mode<synchronous>, transform_indices = @transform_7, window_bounds = array<i64: 1, 16>}]} {
    %c0 = arith.constant 0 : index
    %c0_0 = arith.constant 0 : index
    %0 = vector.load %arg7[%c0, %c0_0] : memref<88x128xf32, #tpu.memory_space<vmem>>, vector<88x128xf32>
    %1 = vector.extract_strided_slice %0 {offsets = [0, 0], sizes = [32, 32], strides = [1, 1]} : vector<88x128xf32> to vector<32x32xf32>
    %2 = vector.extract_strided_slice %0 {offsets = [32, 0], sizes = [16, 32], strides = [1, 1]} : vector<88x128xf32> to vector<16x32xf32>
    %3 = vector.extract_strided_slice %0 {offsets = [48, 0], sizes = [32, 16], strides = [1, 1]} : vector<88x128xf32> to vector<32x16xf32>
    %4 = vector.extract_strided_slice %0 {offsets = [80, 0], sizes = [1, 16], strides = [1, 1]} : vector<88x128xf32> to vector<1x16xf32>
    %5 = vector.extract_strided_slice %0 {offsets = [81, 0], sizes = [1, 16], strides = [1, 1]} : vector<88x128xf32> to vector<1x16xf32>
    %6 = vector.extract_strided_slice %0 {offsets = [82, 0], sizes = [1, 1], strides = [1, 1]} : vector<88x128xf32> to vector<1x1xf32>
    %c0_1 = arith.constant 0 : index
    %c0_2 = arith.constant 0 : index
    %7 = vector.load %arg1[%c0_1, %c0_2] : memref<16x32xf32, #tpu.memory_space<vmem>>, vector<16x32xf32>
    %cst = arith.constant dense<0.000000e+00> : vector<16x32xf32>
    %8 = tpu.matmul %7, %1, %cst {dimension_numbers = #tpu.dot_dimension_numbers<[1], [0], [0], [1], [0, 0, 1, 1], [], []>} : vector<16x32xf32>, vector<32x32xf32>, vector<16x32xf32> -> vector<16x32xf32>
    %9 = arith.addf %8, %2 : vector<16x32xf32>
    %c0_3 = arith.constant 0 : index
    %c0_4 = arith.constant 0 : index
    %c0_5 = arith.constant 0 : index
    %10 = vector.load %arg6[%c0_3, %c0_4, %c0_5] : memref<2x8x128xf32, #tpu.memory_space<vmem>>, vector<1x8x128xf32>
    %11 = vector.shape_cast %10 : vector<1x8x128xf32> to vector<8x128xf32>
    %12 = vector.extract_strided_slice %11 {offsets = [0, 0], sizes = [1, 96], strides = [1, 1]} : vector<8x128xf32> to vector<1x96xf32>
    %13 = vector.extract_strided_slice %11 {offsets = [1, 0], sizes = [1, 32], strides = [1, 1]} : vector<8x128xf32> to vector<1x32xf32>
    %14 = vector.extract_strided_slice %11 {offsets = [2, 0], sizes = [1, 32], strides = [1, 1]} : vector<8x128xf32> to vector<1x32xf32>
    %15 = vector.extract_strided_slice %11 {offsets = [3, 0], sizes = [1, 32], strides = [1, 1]} : vector<8x128xf32> to vector<1x32xf32>
    %16 = vector.extract_strided_slice %11 {offsets = [4, 0], sizes = [1, 128], strides = [1, 1]} : vector<8x128xf32> to vector<1x128xf32>
    %17 = vector.extract_strided_slice %11 {offsets = [5, 0], sizes = [1, 32], strides = [1, 1]} : vector<8x128xf32> to vector<1x32xf32>
    %18 = vector.extract_strided_slice %11 {offsets = [6, 0], sizes = [1, 32], strides = [1, 1]} : vector<8x128xf32> to vector<1x32xf32>
    %19 = vector.extract_strided_slice %11 {offsets = [7, 0], sizes = [1, 32], strides = [1, 1]} : vector<8x128xf32> to vector<1x32xf32>
    %c0_6 = arith.constant 0 : index
    %c0_7 = arith.constant 0 : index
    %c0_8 = arith.constant 0 : index
    %20 = vector.load %arg2[%c0_6, %c0_7, %c0_8] : memref<2x32x96xf32, #tpu.memory_space<vmem>>, vector<1x32x96xf32>
    %21 = vector.shape_cast %20 : vector<1x32x96xf32> to vector<32x96xf32>
    %cst_9 = arith.constant dense<0.000000e+00> : vector<16x96xf32>
    %22 = tpu.matmul %9, %21, %cst_9 {dimension_numbers = #tpu.dot_dimension_numbers<[1], [0], [0], [1], [0, 0, 1, 1], [], []>} : vector<16x32xf32>, vector<32x96xf32>, vector<16x96xf32> -> vector<16x96xf32>
    %23 = vector.broadcast %12 : vector<1x96xf32> to vector<16x96xf32>
    %24 = arith.addf %22, %23 : vector<16x96xf32>
    %25 = vector.extract_strided_slice %24 {offsets = [0, 0], sizes = [8, 8], strides = [1, 1]} : vector<16x96xf32> to vector<8x8xf32>
    %26 = vector.extract_strided_slice %24 {offsets = [0, 32], sizes = [8, 8], strides = [1, 1]} : vector<16x96xf32> to vector<8x8xf32>
    %cst_10 = arith.constant dense<0.000000e+00> : vector<8x8xf32>
    %27 = tpu.matmul %25, %26, %cst_10 {dimension_numbers = #tpu.dot_dimension_numbers<[1], [1], [0], [0], [0, 0, 1, 0], [], []>} : vector<8x8xf32>, vector<8x8xf32>, vector<8x8xf32> -> vector<8x8xf32>
    %28 = vector.extract_strided_slice %24 {offsets = [0, 8], sizes = [8, 8], strides = [1, 1]} : vector<16x96xf32> to vector<8x8xf32>
    %29 = vector.extract_strided_slice %24 {offsets = [0, 40], sizes = [8, 8], strides = [1, 1]} : vector<16x96xf32> to vector<8x8xf32>
    %cst_11 = arith.constant dense<0.000000e+00> : vector<8x8xf32>
    %30 = tpu.matmul %28, %29, %cst_11 {dimension_numbers = #tpu.dot_dimension_numbers<[1], [1], [0], [0], [0, 0, 1, 0], [], []>} : vector<8x8xf32>, vector<8x8xf32>, vector<8x8xf32> -> vector<8x8xf32>
    %31 = vector.extract_strided_slice %24 {offsets = [0, 16], sizes = [8, 8], strides = [1, 1]} : vector<16x96xf32> to vector<8x8xf32>
    %32 = vector.extract_strided_slice %24 {offsets = [0, 48], sizes = [8, 8], strides = [1, 1]} : vector<16x96xf32> to vector<8x8xf32>
    %cst_12 = arith.constant dense<0.000000e+00> : vector<8x8xf32>
    %33 = tpu.matmul %31, %32, %cst_12 {dimension_numbers = #tpu.dot_dimension_numbers<[1], [1], [0], [0], [0, 0, 1, 0], [], []>} : vector<8x8xf32>, vector<8x8xf32>, vector<8x8xf32> -> vector<8x8xf32>
    %34 = vector.extract_strided_slice %24 {offsets = [0, 24], sizes = [8, 8], strides = [1, 1]} : vector<16x96xf32> to vector<8x8xf32>
    %35 = vector.extract_strided_slice %24 {offsets = [0, 56], sizes = [8, 8], strides = [1, 1]} : vector<16x96xf32> to vector<8x8xf32>
    %cst_13 = arith.constant dense<0.000000e+00> : vector<8x8xf32>
    %36 = tpu.matmul %34, %35, %cst_13 {dimension_numbers = #tpu.dot_dimension_numbers<[1], [1], [0], [0], [0, 0, 1, 0], [], []>} : vector<8x8xf32>, vector<8x8xf32>, vector<8x8xf32> -> vector<8x8xf32>
    %37 = vector.extract_strided_slice %24 {offsets = [8, 0], sizes = [8, 8], strides = [1, 1]} : vector<16x96xf32> to vector<8x8xf32>
    %38 = vector.extract_strided_slice %24 {offsets = [8, 32], sizes = [8, 8], strides = [1, 1]} : vector<16x96xf32> to vector<8x8xf32>
    %cst_14 = arith.constant dense<0.000000e+00> : vector<8x8xf32>
    %39 = tpu.matmul %37, %38, %cst_14 {dimension_numbers = #tpu.dot_dimension_numbers<[1], [1], [0], [0], [0, 0, 1, 0], [], []>} : vector<8x8xf32>, vector<8x8xf32>, vector<8x8xf32> -> vector<8x8xf32>
    %40 = vector.extract_strided_slice %24 {offsets = [8, 8], sizes = [8, 8], strides = [1, 1]} : vector<16x96xf32> to vector<8x8xf32>
    %41 = vector.extract_strided_slice %24 {offsets = [8, 40], sizes = [8, 8], strides = [1, 1]} : vector<16x96xf32> to vector<8x8xf32>
    %cst_15 = arith.constant dense<0.000000e+00> : vector<8x8xf32>
    %42 = tpu.matmul %40, %41, %cst_15 {dimension_numbers = #tpu.dot_dimension_numbers<[1], [1], [0], [0], [0, 0, 1, 0], [], []>} : vector<8x8xf32>, vector<8x8xf32>, vector<8x8xf32> -> vector<8x8xf32>
    %43 = vector.extract_strided_slice %24 {offsets = [8, 16], sizes = [8, 8], strides = [1, 1]} : vector<16x96xf32> to vector<8x8xf32>
    %44 = vector.extract_strided_slice %24 {offsets = [8, 48], sizes = [8, 8], strides = [1, 1]} : vector<16x96xf32> to vector<8x8xf32>
    %cst_16 = arith.constant dense<0.000000e+00> : vector<8x8xf32>
    %45 = tpu.matmul %43, %44, %cst_16 {dimension_numbers = #tpu.dot_dimension_numbers<[1], [1], [0], [0], [0, 0, 1, 0], [], []>} : vector<8x8xf32>, vector<8x8xf32>, vector<8x8xf32> -> vector<8x8xf32>
    %46 = vector.extract_strided_slice %24 {offsets = [8, 24], sizes = [8, 8], strides = [1, 1]} : vector<16x96xf32> to vector<8x8xf32>
    %47 = vector.extract_strided_slice %24 {offsets = [8, 56], sizes = [8, 8], strides = [1, 1]} : vector<16x96xf32> to vector<8x8xf32>
    %cst_17 = arith.constant dense<0.000000e+00> : vector<8x8xf32>
    %48 = tpu.matmul %46, %47, %cst_17 {dimension_numbers = #tpu.dot_dimension_numbers<[1], [1], [0], [0], [0, 0, 1, 0], [], []>} : vector<8x8xf32>, vector<8x8xf32>, vector<8x8xf32> -> vector<8x8xf32>
    %49 = tpu.concatenate %27, %30, %33, %36, %39, %42, %45, %48 in 0 : vector<8x8xf32>, vector<8x8xf32>, vector<8x8xf32>, vector<8x8xf32>, vector<8x8xf32>, vector<8x8xf32>, vector<8x8xf32>, vector<8x8xf32> -> vector<64x8xf32>
    %cst_18 = arith.constant 0.353553385 : f32
    %50 = vector.broadcast %cst_18 : f32 to vector<64x8xf32>
    %51 = arith.mulf %49, %50 : vector<64x8xf32>
    %cst_19 = arith.constant dense<0xFF800000> : vector<64xf32>
    %52 = vector.multi_reduction <maximumf>, %51, %cst_19 [1] : vector<64x8xf32> to vector<64xf32>
    %53 = vector.shape_cast %52 : vector<64xf32> to vector<64x1xf32>
    %54 = vector.broadcast %53 : vector<64x1xf32> to vector<64x8xf32>
    %55 = arith.subf %51, %54 : vector<64x8xf32>
    %56 = math.exp %55 : vector<64x8xf32>
    %cst_20 = arith.constant dense<0.000000e+00> : vector<64xf32>
    %57 = vector.multi_reduction <add>, %56, %cst_20 [1] : vector<64x8xf32> to vector<64xf32>
    %58 = vector.shape_cast %57 : vector<64xf32> to vector<64x1xf32>
    %59 = vector.broadcast %58 : vector<64x1xf32> to vector<64x8xf32>
    %60 = arith.divf %56, %59 : vector<64x8xf32>
    %61 = vector.extract_strided_slice %60 {offsets = [0, 0], sizes = [8, 8], strides = [1, 1]} : vector<64x8xf32> to vector<8x8xf32>
    %62 = vector.extract_strided_slice %24 {offsets = [0, 64], sizes = [8, 8], strides = [1, 1]} : vector<16x96xf32> to vector<8x8xf32>
    %cst_21 = arith.constant dense<0.000000e+00> : vector<8x8xf32>
    %63 = tpu.matmul %61, %62, %cst_21 {dimension_numbers = #tpu.dot_dimension_numbers<[1], [0], [0], [1], [0, 0, 1, 1], [], []>} : vector<8x8xf32>, vector<8x8xf32>, vector<8x8xf32> -> vector<8x8xf32>
    %64 = vector.extract_strided_slice %60 {offsets = [8, 0], sizes = [8, 8], strides = [1, 1]} : vector<64x8xf32> to vector<8x8xf32>
    %65 = vector.extract_strided_slice %24 {offsets = [0, 72], sizes = [8, 8], strides = [1, 1]} : vector<16x96xf32> to vector<8x8xf32>
    %cst_22 = arith.constant dense<0.000000e+00> : vector<8x8xf32>
    %66 = tpu.matmul %64, %65, %cst_22 {dimension_numbers = #tpu.dot_dimension_numbers<[1], [0], [0], [1], [0, 0, 1, 1], [], []>} : vector<8x8xf32>, vector<8x8xf32>, vector<8x8xf32> -> vector<8x8xf32>
    %67 = vector.extract_strided_slice %60 {offsets = [16, 0], sizes = [8, 8], strides = [1, 1]} : vector<64x8xf32> to vector<8x8xf32>
    %68 = vector.extract_strided_slice %24 {offsets = [0, 80], sizes = [8, 8], strides = [1, 1]} : vector<16x96xf32> to vector<8x8xf32>
    %cst_23 = arith.constant dense<0.000000e+00> : vector<8x8xf32>
    %69 = tpu.matmul %67, %68, %cst_23 {dimension_numbers = #tpu.dot_dimension_numbers<[1], [0], [0], [1], [0, 0, 1, 1], [], []>} : vector<8x8xf32>, vector<8x8xf32>, vector<8x8xf32> -> vector<8x8xf32>
    %70 = vector.extract_strided_slice %60 {offsets = [24, 0], sizes = [8, 8], strides = [1, 1]} : vector<64x8xf32> to vector<8x8xf32>
    %71 = vector.extract_strided_slice %24 {offsets = [0, 88], sizes = [8, 8], strides = [1, 1]} : vector<16x96xf32> to vector<8x8xf32>
    %cst_24 = arith.constant dense<0.000000e+00> : vector<8x8xf32>
    %72 = tpu.matmul %70, %71, %cst_24 {dimension_numbers = #tpu.dot_dimension_numbers<[1], [0], [0], [1], [0, 0, 1, 1], [], []>} : vector<8x8xf32>, vector<8x8xf32>, vector<8x8xf32> -> vector<8x8xf32>
    %73 = tpu.concatenate %63, %66, %69, %72 in 1 : vector<8x8xf32>, vector<8x8xf32>, vector<8x8xf32>, vector<8x8xf32> -> vector<8x32xf32>
    %74 = vector.extract_strided_slice %60 {offsets = [32, 0], sizes = [8, 8], strides = [1, 1]} : vector<64x8xf32> to vector<8x8xf32>
    %75 = vector.extract_strided_slice %24 {offsets = [8, 64], sizes = [8, 8], strides = [1, 1]} : vector<16x96xf32> to vector<8x8xf32>
    %cst_25 = arith.constant dense<0.000000e+00> : vector<8x8xf32>
    %76 = tpu.matmul %74, %75, %cst_25 {dimension_numbers = #tpu.dot_dimension_numbers<[1], [0], [0], [1], [0, 0, 1, 1], [], []>} : vector<8x8xf32>, vector<8x8xf32>, vector<8x8xf32> -> vector<8x8xf32>
    %77 = vector.extract_strided_slice %60 {offsets = [40, 0], sizes = [8, 8], strides = [1, 1]} : vector<64x8xf32> to vector<8x8xf32>
    %78 = vector.extract_strided_slice %24 {offsets = [8, 72], sizes = [8, 8], strides = [1, 1]} : vector<16x96xf32> to vector<8x8xf32>
    %cst_26 = arith.constant dense<0.000000e+00> : vector<8x8xf32>
    %79 = tpu.matmul %77, %78, %cst_26 {dimension_numbers = #tpu.dot_dimension_numbers<[1], [0], [0], [1], [0, 0, 1, 1], [], []>} : vector<8x8xf32>, vector<8x8xf32>, vector<8x8xf32> -> vector<8x8xf32>
    %80 = vector.extract_strided_slice %60 {offsets = [48, 0], sizes = [8, 8], strides = [1, 1]} : vector<64x8xf32> to vector<8x8xf32>
    %81 = vector.extract_strided_slice %24 {offsets = [8, 80], sizes = [8, 8], strides = [1, 1]} : vector<16x96xf32> to vector<8x8xf32>
    %cst_27 = arith.constant dense<0.000000e+00> : vector<8x8xf32>
    %82 = tpu.matmul %80, %81, %cst_27 {dimension_numbers = #tpu.dot_dimension_numbers<[1], [0], [0], [1], [0, 0, 1, 1], [], []>} : vector<8x8xf32>, vector<8x8xf32>, vector<8x8xf32> -> vector<8x8xf32>
    %83 = vector.extract_strided_slice %60 {offsets = [56, 0], sizes = [8, 8], strides = [1, 1]} : vector<64x8xf32> to vector<8x8xf32>
    %84 = vector.extract_strided_slice %24 {offsets = [8, 88], sizes = [8, 8], strides = [1, 1]} : vector<16x96xf32> to vector<8x8xf32>
    %cst_28 = arith.constant dense<0.000000e+00> : vector<8x8xf32>
    %85 = tpu.matmul %83, %84, %cst_28 {dimension_numbers = #tpu.dot_dimension_numbers<[1], [0], [0], [1], [0, 0, 1, 1], [], []>} : vector<8x8xf32>, vector<8x8xf32>, vector<8x8xf32> -> vector<8x8xf32>
    %86 = tpu.concatenate %76, %79, %82, %85 in 1 : vector<8x8xf32>, vector<8x8xf32>, vector<8x8xf32>, vector<8x8xf32> -> vector<8x32xf32>
    %87 = tpu.concatenate %73, %86 in 0 : vector<8x32xf32>, vector<8x32xf32> -> vector<16x32xf32>
    %c0_29 = arith.constant 0 : index
    %c0_30 = arith.constant 0 : index
    %c0_31 = arith.constant 0 : index
    %88 = vector.load %arg3[%c0_29, %c0_30, %c0_31] : memref<2x32x32xf32, #tpu.memory_space<vmem>>, vector<1x32x32xf32>
    %89 = vector.shape_cast %88 : vector<1x32x32xf32> to vector<32x32xf32>
    %cst_32 = arith.constant dense<0.000000e+00> : vector<16x32xf32>
    %90 = tpu.matmul %87, %89, %cst_32 {dimension_numbers = #tpu.dot_dimension_numbers<[1], [0], [0], [1], [0, 0, 1, 1], [], []>} : vector<16x32xf32>, vector<32x32xf32>, vector<16x32xf32> -> vector<16x32xf32>
    %91 = vector.broadcast %13 : vector<1x32xf32> to vector<16x32xf32>
    %92 = arith.addf %90, %91 : vector<16x32xf32>
    %93 = arith.addf %9, %92 : vector<16x32xf32>
    %cst_33 = arith.constant dense<0.000000e+00> : vector<16xf32>
    %94 = vector.multi_reduction <add>, %93, %cst_33 [1] : vector<16x32xf32> to vector<16xf32>
    %95 = vector.shape_cast %94 : vector<16xf32> to vector<16x1xf32>
    %cst_34 = arith.constant 3.200000e+01 : f32
    %96 = vector.broadcast %cst_34 : f32 to vector<16x1xf32>
    %97 = arith.divf %95, %96 : vector<16x1xf32>
    %98 = vector.broadcast %97 : vector<16x1xf32> to vector<16x32xf32>
    %99 = arith.subf %93, %98 : vector<16x32xf32>
    %100 = arith.mulf %99, %99 : vector<16x32xf32>
    %cst_35 = arith.constant dense<0.000000e+00> : vector<16xf32>
    %101 = vector.multi_reduction <add>, %100, %cst_35 [1] : vector<16x32xf32> to vector<16xf32>
    %102 = vector.shape_cast %101 : vector<16xf32> to vector<16x1xf32>
    %cst_36 = arith.constant 3.200000e+01 : f32
    %103 = vector.broadcast %cst_36 : f32 to vector<16x1xf32>
    %104 = arith.divf %102, %103 : vector<16x1xf32>
    %105 = vector.broadcast %97 : vector<16x1xf32> to vector<16x32xf32>
    %106 = arith.subf %93, %105 : vector<16x32xf32>
    %cst_37 = arith.constant 9.99999974E-6 : f32
    %107 = vector.broadcast %cst_37 : f32 to vector<16x1xf32>
    %108 = arith.addf %104, %107 : vector<16x1xf32>
    %109 = math.rsqrt %108 : vector<16x1xf32>
    %110 = vector.broadcast %109 : vector<16x1xf32> to vector<16x32xf32>
    %111 = arith.mulf %106, %110 : vector<16x32xf32>
    %112 = vector.broadcast %14 : vector<1x32xf32> to vector<16x32xf32>
    %113 = arith.mulf %111, %112 : vector<16x32xf32>
    %114 = vector.broadcast %15 : vector<1x32xf32> to vector<16x32xf32>
    %115 = arith.addf %113, %114 : vector<16x32xf32>
    %c0_38 = arith.constant 0 : index
    %c0_39 = arith.constant 0 : index
    %c0_40 = arith.constant 0 : index
    %116 = vector.load %arg4[%c0_38, %c0_39, %c0_40] : memref<2x32x128xf32, #tpu.memory_space<vmem>>, vector<1x32x128xf32>
    %117 = vector.shape_cast %116 : vector<1x32x128xf32> to vector<32x128xf32>
    %cst_41 = arith.constant dense<0.000000e+00> : vector<16x128xf32>
    %118 = tpu.matmul %115, %117, %cst_41 {dimension_numbers = #tpu.dot_dimension_numbers<[1], [0], [0], [1], [0, 0, 1, 1], [], []>} : vector<16x32xf32>, vector<32x128xf32>, vector<16x128xf32> -> vector<16x128xf32>
    %119 = vector.broadcast %16 : vector<1x128xf32> to vector<16x128xf32>
    %120 = arith.addf %118, %119 : vector<16x128xf32>
    %cst_42 = arith.constant 0.000000e+00 : f32
    %121 = vector.broadcast %cst_42 : f32 to vector<16x128xf32>
    %122 = arith.maximumf %120, %121 : vector<16x128xf32>
    %c0_43 = arith.constant 0 : index
    %c0_44 = arith.constant 0 : index
    %c0_45 = arith.constant 0 : index
    %123 = vector.load %arg5[%c0_43, %c0_44, %c0_45] : memref<2x128x32xf32, #tpu.memory_space<vmem>>, vector<1x128x32xf32>
    %124 = vector.shape_cast %123 : vector<1x128x32xf32> to vector<128x32xf32>
    %cst_46 = arith.constant dense<0.000000e+00> : vector<16x32xf32>
    %125 = tpu.matmul %122, %124, %cst_46 {dimension_numbers = #tpu.dot_dimension_numbers<[1], [0], [0], [1], [0, 0, 1, 1], [], []>} : vector<16x128xf32>, vector<128x32xf32>, vector<16x32xf32> -> vector<16x32xf32>
    %126 = vector.broadcast %17 : vector<1x32xf32> to vector<16x32xf32>
    %127 = arith.addf %125, %126 : vector<16x32xf32>
    %128 = arith.addf %115, %127 : vector<16x32xf32>
    %cst_47 = arith.constant dense<0.000000e+00> : vector<16xf32>
    %129 = vector.multi_reduction <add>, %128, %cst_47 [1] : vector<16x32xf32> to vector<16xf32>
    %130 = vector.shape_cast %129 : vector<16xf32> to vector<16x1xf32>
    %cst_48 = arith.constant 3.200000e+01 : f32
    %131 = vector.broadcast %cst_48 : f32 to vector<16x1xf32>
    %132 = arith.divf %130, %131 : vector<16x1xf32>
    %133 = vector.broadcast %132 : vector<16x1xf32> to vector<16x32xf32>
    %134 = arith.subf %128, %133 : vector<16x32xf32>
    %135 = arith.mulf %134, %134 : vector<16x32xf32>
    %cst_49 = arith.constant dense<0.000000e+00> : vector<16xf32>
    %136 = vector.multi_reduction <add>, %135, %cst_49 [1] : vector<16x32xf32> to vector<16xf32>
    %137 = vector.shape_cast %136 : vector<16xf32> to vector<16x1xf32>
    %cst_50 = arith.constant 3.200000e+01 : f32
    %138 = vector.broadcast %cst_50 : f32 to vector<16x1xf32>
    %139 = arith.divf %137, %138 : vector<16x1xf32>
    %140 = vector.broadcast %132 : vector<16x1xf32> to vector<16x32xf32>
    %141 = arith.subf %128, %140 : vector<16x32xf32>
    %cst_51 = arith.constant 9.99999974E-6 : f32
    %142 = vector.broadcast %cst_51 : f32 to vector<16x1xf32>
    %143 = arith.addf %139, %142 : vector<16x1xf32>
    %144 = math.rsqrt %143 : vector<16x1xf32>
    %145 = vector.broadcast %144 : vector<16x1xf32> to vector<16x32xf32>
    %146 = arith.mulf %141, %145 : vector<16x32xf32>
    %147 = vector.broadcast %18 : vector<1x32xf32> to vector<16x32xf32>
    %148 = arith.mulf %146, %147 : vector<16x32xf32>
    %149 = vector.broadcast %19 : vector<1x32xf32> to vector<16x32xf32>
    %150 = arith.addf %148, %149 : vector<16x32xf32>
    %c1 = arith.constant 1 : index
    %c0_52 = arith.constant 0 : index
    %c0_53 = arith.constant 0 : index
    %151 = vector.load %arg6[%c1, %c0_52, %c0_53] : memref<2x8x128xf32, #tpu.memory_space<vmem>>, vector<1x8x128xf32>
    %152 = vector.shape_cast %151 : vector<1x8x128xf32> to vector<8x128xf32>
    %153 = vector.extract_strided_slice %152 {offsets = [0, 0], sizes = [1, 96], strides = [1, 1]} : vector<8x128xf32> to vector<1x96xf32>
    %154 = vector.extract_strided_slice %152 {offsets = [1, 0], sizes = [1, 32], strides = [1, 1]} : vector<8x128xf32> to vector<1x32xf32>
    %155 = vector.extract_strided_slice %152 {offsets = [2, 0], sizes = [1, 32], strides = [1, 1]} : vector<8x128xf32> to vector<1x32xf32>
    %156 = vector.extract_strided_slice %152 {offsets = [3, 0], sizes = [1, 32], strides = [1, 1]} : vector<8x128xf32> to vector<1x32xf32>
    %157 = vector.extract_strided_slice %152 {offsets = [4, 0], sizes = [1, 128], strides = [1, 1]} : vector<8x128xf32> to vector<1x128xf32>
    %158 = vector.extract_strided_slice %152 {offsets = [5, 0], sizes = [1, 32], strides = [1, 1]} : vector<8x128xf32> to vector<1x32xf32>
    %159 = vector.extract_strided_slice %152 {offsets = [6, 0], sizes = [1, 32], strides = [1, 1]} : vector<8x128xf32> to vector<1x32xf32>
    %160 = vector.extract_strided_slice %152 {offsets = [7, 0], sizes = [1, 32], strides = [1, 1]} : vector<8x128xf32> to vector<1x32xf32>
    %c1_54 = arith.constant 1 : index
    %c0_55 = arith.constant 0 : index
    %c0_56 = arith.constant 0 : index
    %161 = vector.load %arg2[%c1_54, %c0_55, %c0_56] : memref<2x32x96xf32, #tpu.memory_space<vmem>>, vector<1x32x96xf32>
    %162 = vector.shape_cast %161 : vector<1x32x96xf32> to vector<32x96xf32>
    %cst_57 = arith.constant dense<0.000000e+00> : vector<16x96xf32>
    %163 = tpu.matmul %150, %162, %cst_57 {dimension_numbers = #tpu.dot_dimension_numbers<[1], [0], [0], [1], [0, 0, 1, 1], [], []>} : vector<16x32xf32>, vector<32x96xf32>, vector<16x96xf32> -> vector<16x96xf32>
    %164 = vector.broadcast %153 : vector<1x96xf32> to vector<16x96xf32>
    %165 = arith.addf %163, %164 : vector<16x96xf32>
    %166 = vector.extract_strided_slice %165 {offsets = [0, 0], sizes = [8, 8], strides = [1, 1]} : vector<16x96xf32> to vector<8x8xf32>
    %167 = vector.extract_strided_slice %165 {offsets = [0, 32], sizes = [8, 8], strides = [1, 1]} : vector<16x96xf32> to vector<8x8xf32>
    %cst_58 = arith.constant dense<0.000000e+00> : vector<8x8xf32>
    %168 = tpu.matmul %166, %167, %cst_58 {dimension_numbers = #tpu.dot_dimension_numbers<[1], [1], [0], [0], [0, 0, 1, 0], [], []>} : vector<8x8xf32>, vector<8x8xf32>, vector<8x8xf32> -> vector<8x8xf32>
    %169 = vector.extract_strided_slice %165 {offsets = [0, 8], sizes = [8, 8], strides = [1, 1]} : vector<16x96xf32> to vector<8x8xf32>
    %170 = vector.extract_strided_slice %165 {offsets = [0, 40], sizes = [8, 8], strides = [1, 1]} : vector<16x96xf32> to vector<8x8xf32>
    %cst_59 = arith.constant dense<0.000000e+00> : vector<8x8xf32>
    %171 = tpu.matmul %169, %170, %cst_59 {dimension_numbers = #tpu.dot_dimension_numbers<[1], [1], [0], [0], [0, 0, 1, 0], [], []>} : vector<8x8xf32>, vector<8x8xf32>, vector<8x8xf32> -> vector<8x8xf32>
    %172 = vector.extract_strided_slice %165 {offsets = [0, 16], sizes = [8, 8], strides = [1, 1]} : vector<16x96xf32> to vector<8x8xf32>
    %173 = vector.extract_strided_slice %165 {offsets = [0, 48], sizes = [8, 8], strides = [1, 1]} : vector<16x96xf32> to vector<8x8xf32>
    %cst_60 = arith.constant dense<0.000000e+00> : vector<8x8xf32>
    %174 = tpu.matmul %172, %173, %cst_60 {dimension_numbers = #tpu.dot_dimension_numbers<[1], [1], [0], [0], [0, 0, 1, 0], [], []>} : vector<8x8xf32>, vector<8x8xf32>, vector<8x8xf32> -> vector<8x8xf32>
    %175 = vector.extract_strided_slice %165 {offsets = [0, 24], sizes = [8, 8], strides = [1, 1]} : vector<16x96xf32> to vector<8x8xf32>
    %176 = vector.extract_strided_slice %165 {offsets = [0, 56], sizes = [8, 8], strides = [1, 1]} : vector<16x96xf32> to vector<8x8xf32>
    %cst_61 = arith.constant dense<0.000000e+00> : vector<8x8xf32>
    %177 = tpu.matmul %175, %176, %cst_61 {dimension_numbers = #tpu.dot_dimension_numbers<[1], [1], [0], [0], [0, 0, 1, 0], [], []>} : vector<8x8xf32>, vector<8x8xf32>, vector<8x8xf32> -> vector<8x8xf32>
    %178 = vector.extract_strided_slice %165 {offsets = [8, 0], sizes = [8, 8], strides = [1, 1]} : vector<16x96xf32> to vector<8x8xf32>
    %179 = vector.extract_strided_slice %165 {offsets = [8, 32], sizes = [8, 8], strides = [1, 1]} : vector<16x96xf32> to vector<8x8xf32>
    %cst_62 = arith.constant dense<0.000000e+00> : vector<8x8xf32>
    %180 = tpu.matmul %178, %179, %cst_62 {dimension_numbers = #tpu.dot_dimension_numbers<[1], [1], [0], [0], [0, 0, 1, 0], [], []>} : vector<8x8xf32>, vector<8x8xf32>, vector<8x8xf32> -> vector<8x8xf32>
    %181 = vector.extract_strided_slice %165 {offsets = [8, 8], sizes = [8, 8], strides = [1, 1]} : vector<16x96xf32> to vector<8x8xf32>
    %182 = vector.extract_strided_slice %165 {offsets = [8, 40], sizes = [8, 8], strides = [1, 1]} : vector<16x96xf32> to vector<8x8xf32>
    %cst_63 = arith.constant dense<0.000000e+00> : vector<8x8xf32>
    %183 = tpu.matmul %181, %182, %cst_63 {dimension_numbers = #tpu.dot_dimension_numbers<[1], [1], [0], [0], [0, 0, 1, 0], [], []>} : vector<8x8xf32>, vector<8x8xf32>, vector<8x8xf32> -> vector<8x8xf32>
    %184 = vector.extract_strided_slice %165 {offsets = [8, 16], sizes = [8, 8], strides = [1, 1]} : vector<16x96xf32> to vector<8x8xf32>
    %185 = vector.extract_strided_slice %165 {offsets = [8, 48], sizes = [8, 8], strides = [1, 1]} : vector<16x96xf32> to vector<8x8xf32>
    %cst_64 = arith.constant dense<0.000000e+00> : vector<8x8xf32>
    %186 = tpu.matmul %184, %185, %cst_64 {dimension_numbers = #tpu.dot_dimension_numbers<[1], [1], [0], [0], [0, 0, 1, 0], [], []>} : vector<8x8xf32>, vector<8x8xf32>, vector<8x8xf32> -> vector<8x8xf32>
    %187 = vector.extract_strided_slice %165 {offsets = [8, 24], sizes = [8, 8], strides = [1, 1]} : vector<16x96xf32> to vector<8x8xf32>
    %188 = vector.extract_strided_slice %165 {offsets = [8, 56], sizes = [8, 8], strides = [1, 1]} : vector<16x96xf32> to vector<8x8xf32>
    %cst_65 = arith.constant dense<0.000000e+00> : vector<8x8xf32>
    %189 = tpu.matmul %187, %188, %cst_65 {dimension_numbers = #tpu.dot_dimension_numbers<[1], [1], [0], [0], [0, 0, 1, 0], [], []>} : vector<8x8xf32>, vector<8x8xf32>, vector<8x8xf32> -> vector<8x8xf32>
    %190 = tpu.concatenate %168, %171, %174, %177, %180, %183, %186, %189 in 0 : vector<8x8xf32>, vector<8x8xf32>, vector<8x8xf32>, vector<8x8xf32>, vector<8x8xf32>, vector<8x8xf32>, vector<8x8xf32>, vector<8x8xf32> -> vector<64x8xf32>
    %cst_66 = arith.constant 0.353553385 : f32
    %191 = vector.broadcast %cst_66 : f32 to vector<64x8xf32>
    %192 = arith.mulf %190, %191 : vector<64x8xf32>
    %cst_67 = arith.constant dense<0xFF800000> : vector<64xf32>
    %193 = vector.multi_reduction <maximumf>, %192, %cst_67 [1] : vector<64x8xf32> to vector<64xf32>
    %194 = vector.shape_cast %193 : vector<64xf32> to vector<64x1xf32>
    %195 = vector.broadcast %194 : vector<64x1xf32> to vector<64x8xf32>
    %196 = arith.subf %192, %195 : vector<64x8xf32>
    %197 = math.exp %196 : vector<64x8xf32>
    %cst_68 = arith.constant dense<0.000000e+00> : vector<64xf32>
    %198 = vector.multi_reduction <add>, %197, %cst_68 [1] : vector<64x8xf32> to vector<64xf32>
    %199 = vector.shape_cast %198 : vector<64xf32> to vector<64x1xf32>
    %200 = vector.broadcast %199 : vector<64x1xf32> to vector<64x8xf32>
    %201 = arith.divf %197, %200 : vector<64x8xf32>
    %202 = vector.extract_strided_slice %201 {offsets = [0, 0], sizes = [8, 8], strides = [1, 1]} : vector<64x8xf32> to vector<8x8xf32>
    %203 = vector.extract_strided_slice %165 {offsets = [0, 64], sizes = [8, 8], strides = [1, 1]} : vector<16x96xf32> to vector<8x8xf32>
    %cst_69 = arith.constant dense<0.000000e+00> : vector<8x8xf32>
    %204 = tpu.matmul %202, %203, %cst_69 {dimension_numbers = #tpu.dot_dimension_numbers<[1], [0], [0], [1], [0, 0, 1, 1], [], []>} : vector<8x8xf32>, vector<8x8xf32>, vector<8x8xf32> -> vector<8x8xf32>
    %205 = vector.extract_strided_slice %201 {offsets = [8, 0], sizes = [8, 8], strides = [1, 1]} : vector<64x8xf32> to vector<8x8xf32>
    %206 = vector.extract_strided_slice %165 {offsets = [0, 72], sizes = [8, 8], strides = [1, 1]} : vector<16x96xf32> to vector<8x8xf32>
    %cst_70 = arith.constant dense<0.000000e+00> : vector<8x8xf32>
    %207 = tpu.matmul %205, %206, %cst_70 {dimension_numbers = #tpu.dot_dimension_numbers<[1], [0], [0], [1], [0, 0, 1, 1], [], []>} : vector<8x8xf32>, vector<8x8xf32>, vector<8x8xf32> -> vector<8x8xf32>
    %208 = vector.extract_strided_slice %201 {offsets = [16, 0], sizes = [8, 8], strides = [1, 1]} : vector<64x8xf32> to vector<8x8xf32>
    %209 = vector.extract_strided_slice %165 {offsets = [0, 80], sizes = [8, 8], strides = [1, 1]} : vector<16x96xf32> to vector<8x8xf32>
    %cst_71 = arith.constant dense<0.000000e+00> : vector<8x8xf32>
    %210 = tpu.matmul %208, %209, %cst_71 {dimension_numbers = #tpu.dot_dimension_numbers<[1], [0], [0], [1], [0, 0, 1, 1], [], []>} : vector<8x8xf32>, vector<8x8xf32>, vector<8x8xf32> -> vector<8x8xf32>
    %211 = vector.extract_strided_slice %201 {offsets = [24, 0], sizes = [8, 8], strides = [1, 1]} : vector<64x8xf32> to vector<8x8xf32>
    %212 = vector.extract_strided_slice %165 {offsets = [0, 88], sizes = [8, 8], strides = [1, 1]} : vector<16x96xf32> to vector<8x8xf32>
    %cst_72 = arith.constant dense<0.000000e+00> : vector<8x8xf32>
    %213 = tpu.matmul %211, %212, %cst_72 {dimension_numbers = #tpu.dot_dimension_numbers<[1], [0], [0], [1], [0, 0, 1, 1], [], []>} : vector<8x8xf32>, vector<8x8xf32>, vector<8x8xf32> -> vector<8x8xf32>
    %214 = tpu.concatenate %204, %207, %210, %213 in 1 : vector<8x8xf32>, vector<8x8xf32>, vector<8x8xf32>, vector<8x8xf32> -> vector<8x32xf32>
    %215 = vector.extract_strided_slice %201 {offsets = [32, 0], sizes = [8, 8], strides = [1, 1]} : vector<64x8xf32> to vector<8x8xf32>
    %216 = vector.extract_strided_slice %165 {offsets = [8, 64], sizes = [8, 8], strides = [1, 1]} : vector<16x96xf32> to vector<8x8xf32>
    %cst_73 = arith.constant dense<0.000000e+00> : vector<8x8xf32>
    %217 = tpu.matmul %215, %216, %cst_73 {dimension_numbers = #tpu.dot_dimension_numbers<[1], [0], [0], [1], [0, 0, 1, 1], [], []>} : vector<8x8xf32>, vector<8x8xf32>, vector<8x8xf32> -> vector<8x8xf32>
    %218 = vector.extract_strided_slice %201 {offsets = [40, 0], sizes = [8, 8], strides = [1, 1]} : vector<64x8xf32> to vector<8x8xf32>
    %219 = vector.extract_strided_slice %165 {offsets = [8, 72], sizes = [8, 8], strides = [1, 1]} : vector<16x96xf32> to vector<8x8xf32>
    %cst_74 = arith.constant dense<0.000000e+00> : vector<8x8xf32>
    %220 = tpu.matmul %218, %219, %cst_74 {dimension_numbers = #tpu.dot_dimension_numbers<[1], [0], [0], [1], [0, 0, 1, 1], [], []>} : vector<8x8xf32>, vector<8x8xf32>, vector<8x8xf32> -> vector<8x8xf32>
    %221 = vector.extract_strided_slice %201 {offsets = [48, 0], sizes = [8, 8], strides = [1, 1]} : vector<64x8xf32> to vector<8x8xf32>
    %222 = vector.extract_strided_slice %165 {offsets = [8, 80], sizes = [8, 8], strides = [1, 1]} : vector<16x96xf32> to vector<8x8xf32>
    %cst_75 = arith.constant dense<0.000000e+00> : vector<8x8xf32>
    %223 = tpu.matmul %221, %222, %cst_75 {dimension_numbers = #tpu.dot_dimension_numbers<[1], [0], [0], [1], [0, 0, 1, 1], [], []>} : vector<8x8xf32>, vector<8x8xf32>, vector<8x8xf32> -> vector<8x8xf32>
    %224 = vector.extract_strided_slice %201 {offsets = [56, 0], sizes = [8, 8], strides = [1, 1]} : vector<64x8xf32> to vector<8x8xf32>
    %225 = vector.extract_strided_slice %165 {offsets = [8, 88], sizes = [8, 8], strides = [1, 1]} : vector<16x96xf32> to vector<8x8xf32>
    %cst_76 = arith.constant dense<0.000000e+00> : vector<8x8xf32>
    %226 = tpu.matmul %224, %225, %cst_76 {dimension_numbers = #tpu.dot_dimension_numbers<[1], [0], [0], [1], [0, 0, 1, 1], [], []>} : vector<8x8xf32>, vector<8x8xf32>, vector<8x8xf32> -> vector<8x8xf32>
    %227 = tpu.concatenate %217, %220, %223, %226 in 1 : vector<8x8xf32>, vector<8x8xf32>, vector<8x8xf32>, vector<8x8xf32> -> vector<8x32xf32>
    %228 = tpu.concatenate %214, %227 in 0 : vector<8x32xf32>, vector<8x32xf32> -> vector<16x32xf32>
    %c1_77 = arith.constant 1 : index
    %c0_78 = arith.constant 0 : index
    %c0_79 = arith.constant 0 : index
    %229 = vector.load %arg3[%c1_77, %c0_78, %c0_79] : memref<2x32x32xf32, #tpu.memory_space<vmem>>, vector<1x32x32xf32>
    %230 = vector.shape_cast %229 : vector<1x32x32xf32> to vector<32x32xf32>
    %cst_80 = arith.constant dense<0.000000e+00> : vector<16x32xf32>
    %231 = tpu.matmul %228, %230, %cst_80 {dimension_numbers = #tpu.dot_dimension_numbers<[1], [0], [0], [1], [0, 0, 1, 1], [], []>} : vector<16x32xf32>, vector<32x32xf32>, vector<16x32xf32> -> vector<16x32xf32>
    %232 = vector.broadcast %154 : vector<1x32xf32> to vector<16x32xf32>
    %233 = arith.addf %231, %232 : vector<16x32xf32>
    %234 = arith.addf %150, %233 : vector<16x32xf32>
    %cst_81 = arith.constant dense<0.000000e+00> : vector<16xf32>
    %235 = vector.multi_reduction <add>, %234, %cst_81 [1] : vector<16x32xf32> to vector<16xf32>
    %236 = vector.shape_cast %235 : vector<16xf32> to vector<16x1xf32>
    %cst_82 = arith.constant 3.200000e+01 : f32
    %237 = vector.broadcast %cst_82 : f32 to vector<16x1xf32>
    %238 = arith.divf %236, %237 : vector<16x1xf32>
    %239 = vector.broadcast %238 : vector<16x1xf32> to vector<16x32xf32>
    %240 = arith.subf %234, %239 : vector<16x32xf32>
    %241 = arith.mulf %240, %240 : vector<16x32xf32>
    %cst_83 = arith.constant dense<0.000000e+00> : vector<16xf32>
    %242 = vector.multi_reduction <add>, %241, %cst_83 [1] : vector<16x32xf32> to vector<16xf32>
    %243 = vector.shape_cast %242 : vector<16xf32> to vector<16x1xf32>
    %cst_84 = arith.constant 3.200000e+01 : f32
    %244 = vector.broadcast %cst_84 : f32 to vector<16x1xf32>
    %245 = arith.divf %243, %244 : vector<16x1xf32>
    %246 = vector.broadcast %238 : vector<16x1xf32> to vector<16x32xf32>
    %247 = arith.subf %234, %246 : vector<16x32xf32>
    %cst_85 = arith.constant 9.99999974E-6 : f32
    %248 = vector.broadcast %cst_85 : f32 to vector<16x1xf32>
    %249 = arith.addf %245, %248 : vector<16x1xf32>
    %250 = math.rsqrt %249 : vector<16x1xf32>
    %251 = vector.broadcast %250 : vector<16x1xf32> to vector<16x32xf32>
    %252 = arith.mulf %247, %251 : vector<16x32xf32>
    %253 = vector.broadcast %155 : vector<1x32xf32> to vector<16x32xf32>
    %254 = arith.mulf %252, %253 : vector<16x32xf32>
    %255 = vector.broadcast %156 : vector<1x32xf32> to vector<16x32xf32>
    %256 = arith.addf %254, %255 : vector<16x32xf32>
    %c1_86 = arith.constant 1 : index
    %c0_87 = arith.constant 0 : index
    %c0_88 = arith.constant 0 : index
    %257 = vector.load %arg4[%c1_86, %c0_87, %c0_88] : memref<2x32x128xf32, #tpu.memory_space<vmem>>, vector<1x32x128xf32>
    %258 = vector.shape_cast %257 : vector<1x32x128xf32> to vector<32x128xf32>
    %cst_89 = arith.constant dense<0.000000e+00> : vector<16x128xf32>
    %259 = tpu.matmul %256, %258, %cst_89 {dimension_numbers = #tpu.dot_dimension_numbers<[1], [0], [0], [1], [0, 0, 1, 1], [], []>} : vector<16x32xf32>, vector<32x128xf32>, vector<16x128xf32> -> vector<16x128xf32>
    %260 = vector.broadcast %157 : vector<1x128xf32> to vector<16x128xf32>
    %261 = arith.addf %259, %260 : vector<16x128xf32>
    %cst_90 = arith.constant 0.000000e+00 : f32
    %262 = vector.broadcast %cst_90 : f32 to vector<16x128xf32>
    %263 = arith.maximumf %261, %262 : vector<16x128xf32>
    %c1_91 = arith.constant 1 : index
    %c0_92 = arith.constant 0 : index
    %c0_93 = arith.constant 0 : index
    %264 = vector.load %arg5[%c1_91, %c0_92, %c0_93] : memref<2x128x32xf32, #tpu.memory_space<vmem>>, vector<1x128x32xf32>
    %265 = vector.shape_cast %264 : vector<1x128x32xf32> to vector<128x32xf32>
    %cst_94 = arith.constant dense<0.000000e+00> : vector<16x32xf32>
    %266 = tpu.matmul %263, %265, %cst_94 {dimension_numbers = #tpu.dot_dimension_numbers<[1], [0], [0], [1], [0, 0, 1, 1], [], []>} : vector<16x128xf32>, vector<128x32xf32>, vector<16x32xf32> -> vector<16x32xf32>
    %267 = vector.broadcast %158 : vector<1x32xf32> to vector<16x32xf32>
    %268 = arith.addf %266, %267 : vector<16x32xf32>
    %269 = arith.addf %256, %268 : vector<16x32xf32>
    %cst_95 = arith.constant dense<0.000000e+00> : vector<16xf32>
    %270 = vector.multi_reduction <add>, %269, %cst_95 [1] : vector<16x32xf32> to vector<16xf32>
    %271 = vector.shape_cast %270 : vector<16xf32> to vector<16x1xf32>
    %cst_96 = arith.constant 3.200000e+01 : f32
    %272 = vector.broadcast %cst_96 : f32 to vector<16x1xf32>
    %273 = arith.divf %271, %272 : vector<16x1xf32>
    %274 = vector.broadcast %273 : vector<16x1xf32> to vector<16x32xf32>
    %275 = arith.subf %269, %274 : vector<16x32xf32>
    %276 = arith.mulf %275, %275 : vector<16x32xf32>
    %cst_97 = arith.constant dense<0.000000e+00> : vector<16xf32>
    %277 = vector.multi_reduction <add>, %276, %cst_97 [1] : vector<16x32xf32> to vector<16xf32>
    %278 = vector.shape_cast %277 : vector<16xf32> to vector<16x1xf32>
    %cst_98 = arith.constant 3.200000e+01 : f32
    %279 = vector.broadcast %cst_98 : f32 to vector<16x1xf32>
    %280 = arith.divf %278, %279 : vector<16x1xf32>
    %281 = vector.broadcast %273 : vector<16x1xf32> to vector<16x32xf32>
    %282 = arith.subf %269, %281 : vector<16x32xf32>
    %cst_99 = arith.constant 9.99999974E-6 : f32
    %283 = vector.broadcast %cst_99 : f32 to vector<16x1xf32>
    %284 = arith.addf %280, %283 : vector<16x1xf32>
    %285 = math.rsqrt %284 : vector<16x1xf32>
    %286 = vector.broadcast %285 : vector<16x1xf32> to vector<16x32xf32>
    %287 = arith.mulf %282, %286 : vector<16x32xf32>
    %288 = vector.broadcast %159 : vector<1x32xf32> to vector<16x32xf32>
    %289 = arith.mulf %287, %288 : vector<16x32xf32>
    %290 = vector.broadcast %160 : vector<1x32xf32> to vector<16x32xf32>
    %291 = arith.addf %289, %290 : vector<16x32xf32>
    %cst_100 = arith.constant dense<0.000000e+00> : vector<16x16xf32>
    %292 = tpu.matmul %291, %3, %cst_100 {dimension_numbers = #tpu.dot_dimension_numbers<[1], [0], [0], [1], [0, 0, 1, 1], [], []>} : vector<16x32xf32>, vector<32x16xf32>, vector<16x16xf32> -> vector<16x16xf32>
    %293 = vector.broadcast %4 : vector<1x16xf32> to vector<16x16xf32>
    %294 = arith.addf %292, %293 : vector<16x16xf32>
    %cst_101 = arith.constant 0.000000e+00 : f32
    %295 = vector.broadcast %cst_101 : f32 to vector<16x16xf32>
    %296 = arith.maximumf %294, %295 : vector<16x16xf32>
    %cst_102 = arith.constant dense<0.000000e+00> : vector<1x16xf32>
    %297 = tpu.matmul %5, %296, %cst_102 {dimension_numbers = #tpu.dot_dimension_numbers<[1], [1], [0], [0], [0, 0, 1, 0], [], []>} : vector<1x16xf32>, vector<16x16xf32>, vector<1x16xf32> -> vector<1x16xf32>
    %298 = vector.broadcast %6 : vector<1x1xf32> to vector<1x16xf32>
    %299 = arith.addf %297, %298 : vector<1x16xf32>
    %300 = arith.negf %299 : vector<1x16xf32>
    %301 = math.exp %300 : vector<1x16xf32>
    %cst_103 = arith.constant 1.000000e+00 : f32
    %302 = vector.broadcast %cst_103 : f32 to vector<1x16xf32>
    %303 = arith.addf %302, %301 : vector<1x16xf32>
    %304 = arith.divf %302, %303 : vector<1x16xf32>
    %c0_104 = arith.constant 0 : index
    %c0_105 = arith.constant 0 : index
    %305 = vector.load %arg8[%c0_104, %c0_105] : memref<1x16xf32, #tpu.memory_space<vmem>>, vector<1x16xf32>
    tpu.vector_store %arg8[%c0_104, %c0_105], %304 {strides = array<i32>} : memref<1x16xf32, #tpu.memory_space<vmem>>, vector<1x16xf32>,
    return
  }
  func.func @transform_0(%arg0: i32) -> (i32, i32) {
    %c0_i32 = arith.constant 0 : i32
    %c0_i32_0 = arith.constant 0 : i32
    %c0_i32_1 = arith.constant 0 : i32
    return %c0_i32, %c0_i32_0 : i32, i32
  }
  func.func @transform_1(%arg0: i32) -> (i32, i32, i32) {
    %c0_i32 = arith.constant 0 : i32
    %c0_i32_0 = arith.constant 0 : i32
    %c0_i32_1 = arith.constant 0 : i32
    %c0_i32_2 = arith.constant 0 : i32
    return %c0_i32, %c0_i32_0, %c0_i32_1 : i32, i32, i32
  }
  func.func @transform_2(%arg0: i32) -> (i32, i32, i32) {
    %c0_i32 = arith.constant 0 : i32
    %c0_i32_0 = arith.constant 0 : i32
    %c0_i32_1 = arith.constant 0 : i32
    %c0_i32_2 = arith.constant 0 : i32
    return %c0_i32, %c0_i32_0, %c0_i32_1 : i32, i32, i32
  }
  func.func @transform_3(%arg0: i32) -> (i32, i32, i32) {
    %c0_i32 = arith.constant 0 : i32
    %c0_i32_0 = arith.constant 0 : i32
    %c0_i32_1 = arith.constant 0 : i32
    %c0_i32_2 = arith.constant 0 : i32
    return %c0_i32, %c0_i32_0, %c0_i32_1 : i32, i32, i32
  }
  func.func @transform_4(%arg0: i32) -> (i32, i32, i32) {
    %c0_i32 = arith.constant 0 : i32
    %c0_i32_0 = arith.constant 0 : i32
    %c0_i32_1 = arith.constant 0 : i32
    %c0_i32_2 = arith.constant 0 : i32
    return %c0_i32, %c0_i32_0, %c0_i32_1 : i32, i32, i32
  }
  func.func @transform_5(%arg0: i32) -> (i32, i32, i32) {
    %c0_i32 = arith.constant 0 : i32
    %c0_i32_0 = arith.constant 0 : i32
    %c0_i32_1 = arith.constant 0 : i32
    %c0_i32_2 = arith.constant 0 : i32
    return %c0_i32, %c0_i32_0, %c0_i32_1 : i32, i32, i32
  }
  func.func @transform_6(%arg0: i32) -> (i32, i32) {
    %c0_i32 = arith.constant 0 : i32
    %c0_i32_0 = arith.constant 0 : i32
    %c0_i32_1 = arith.constant 0 : i32
    return %c0_i32, %c0_i32_0 : i32, i32
  }
  func.func @transform_7(%arg0: i32) -> (i32, i32) {
    %c0_i32 = arith.constant 0 : i32
    %c0_i32_0 = arith.constant 0 : i32
    %c0_i32_1 = arith.constant 0 : i32
    return %c0_i32, %c0_i32_0 : i32, i32
  }
}

</mosaic_0001>

<bundles_post_ra>
// kernel: tpu_custom_call.1
= control target key start
LH: loop header
LB: loop body
LE: loop exit
PB: predicated region body
PF: predicated region fallthrough
CT: control target
= control target key end

     0   :  { %vm40_vm0 = vcmask 261120   ;;  %s5362_s0 = inlined_call_operand.vmem [shape: f32[16,32], index: 0, kind: input, shape index: {}]   ;;  %s5363_s1 = inlined_call_operand.vmem [shape: f32[2,32,96], index: 1, kind: input, shape index: {}]   ;;  %s5364_s2 = inlined_call_operand.vmem [shape: f32[2,32,32], index: 2, kind: input, shape index: {}]   ;;  %s5365_s3 = inlined_call_operand.vmem [shape: f32[2,32,128], index: 3, kind: input, shape index: {}]   ;;  %s5366_s4 = inlined_call_operand.vmem [shape: f32[2,128,32], index: 4, kind: input, shape index: {}]   ;;  %s5367_s5 = inlined_call_operand.vmem [shape: f32[2,8,128], index: 5, kind: input, shape index: {}]   ;;  %s5368_s6 = inlined_call_operand.vmem [shape: f32[88,128], index: 6, kind: input, shape index: {}]   ;;  %s5369_s7 = inlined_call_operand.hbm [shape: f32[1,16], index: 7, kind: output, shape index: {}]  }
   0x1   :  { %v30_v0 = vld [vmem:[%s5368_s6 + $0x18] sm:$0xff]  ;;  %v29_v1 = vld [vmem:[%s5368_s6 + $0x10] sm:$0xff]  ;;  %v38_v2 = vld [vmem:[%s5362_s0] sm:$0xff] }
   0x2   :  { %4175 = vmatprep.subr.mxu1 %v30_v0  ;;  %v28_v3 = vld [vmem:[%s5368_s6 + $0x8] sm:$0xff]  ;;  %4183 = vmatprep.mubr.msk.f32.mxu1 %vm40_vm0, %v38_v2 }
   0x3   :  { %4176 = vmatpush3.msra.mxu1 %v30_v0 }
   0x4   :  { %12 = vsyncpa [#allocation3], 0  ;;  %4177 = vmatprep.subr.mxu1 %v29_v1  ;;  %v27_v4 = vld [vmem:[%s5368_s6] sm:$0xff]  ;;  %v39_v5 = vld [vmem:[%s5362_s0 + $0x8] sm:$0xff]  ;;  %v127_v16 = vlaneseq  ;;  %v4626_v18 = vmov 0.0   ;;  %vm4627_vm1 = vmmov 0  }
   0x5   :  { %4178 = vmatpush3.msra.mxu1 %v29_v1  ;;  %v126_v6 = vld [vmem:[%s5363_s1 + $0x18] sm:$0xff]  ;;  %v125_v7 = vld [vmem:[%s5363_s1 + $0x10] sm:$0xff]  ;;  %v124_v8 = vld [vmem:[%s5363_s1 + $0x8] sm:$0xff]  ;;  %4197 = vmatprep.subr.mxu0 %v4626_v18  ;;  %s4628_s26 = smov 88   ;;  %s4629_s27 = smov 96   ;;  %vm215_vm2 = vcmask 64512  }
   0x6   :  { %4179 = vmatprep.subr.mxu1 %v28_v3  ;;  %v123_v9 = vld [vmem:[%s5363_s1] sm:$0xff]  ;;  %v32_v12 = vld [vmem:[%s5368_s6 + $0x28] sm:$0xff]  ;;  %v4730_v17 = vshrl.u32 %v127_v16, 7  ;;  %4199 = vmatprep.mubr.msk.f32.mxu0 %vm4627_vm1, %v4626_v18  ;;  %s4630_s28 = smov 120   ;;  %s4631_s29 = smov 80   ;;  %vm1248_vm3 = vcmask 130048  }
   0x7   :  { %4180 = vmatpush3.msra.mxu1 %v28_v3  ;;  %v31_v11 = vld [vmem:[%s5368_s6 + $0x20] sm:$0xff]  ;;  %s4632_s30 = smov 112   ;;  %s4633_s8 = smov 72   ;;  %vm1250_vm4 = vcmask 195584   ;;  %vm3911_vm5 = vcmask 122880  }
   0x8   :  { %4181 = vmatprep.subr.mxu1 %v27_v4  ;;  %v4735_v19 = vsub.s32 0, %v4730_v17  ;;  %v4740_v20 = vld [vmem:[%s5367_s5] sm:$0xff]  ;;  %s4634_s9 = smov 104   ;;  %s4635_s10 = smov 64  }
   0x9   :  { %4182 = vmatpush3.msra.mxu1 %v27_v4  ;;  %s4636_s11 = smov 48   ;;  %s4637_s12 = smov 56  }
   0xa   :  { %4184 = vmatmul.mubr.msk.f32.vlgmr.msra.gmra.mxu1 %vm40_vm0, %v39_v5  ;;  %4186 = vmatprep.subr.mxu1 %v126_v6  ;;  %v130_v21 = vrot.slane %v4740_v20, %v4735_v19  ;;  %s4638_s13 = smov 40   ;;  %s4639_s19 = smov 8  }
   0xb   :  { %4187 = vmatpush3.msra.mxu1 %v126_v6  ;;  %s4640_s20 = smov 16   ;;  %s4641_s23 = smov 24  }
   0xc   :  { %4188 = vmatprep.subr.mxu1 %v125_v7 }
   0xd   :  { %4189 = vmatpush3.msra.mxu1 %v125_v7 }
   0xe   :  { %4190 = vmatprep.subr.mxu1 %v124_v8 }
   0xf   :  { %4191 = vmatpush3.msra.mxu1 %v124_v8 }
  0x10   :  { %4192 = vmatprep.subr.mxu1 %v123_v9 }
  0x11   :  { %4193 = vmatpush3.msra.mxu1 %v123_v9 }
  0x12   :  { %4202 = vmatprep.subr.mxu1 %v4626_v18 }
  0xca   :  { %v4185_v10 = vpop.f32.mrf.mxu1 }
  0xcb   :  { %v4724_v15 = vadd.f32 %v4185_v10, %v32_v12 }
  0xcc   :  { %v113_v13 = vpop.f32.mrf.mxu1 }
  0xcd   :  { %v4722_v14 = vadd.f32 %v113_v13, %v31_v11 }
  0xcf   :  { %4194 = vmatprep.mubr.msk.f32.mxu1 %vm40_vm0, %v4722_v14 }
  0xd0   :  { %4195 = vmatmul.mubr.msk.f32.vlgmr.msra.gmra.mxu1 %vm40_vm0, %v4724_v15 }
  0xd1   :  { %4204 = vmatprep.mubr.msk.f32.mxu1 %vm4627_vm1, %v4626_v18 }
 0x190   :  { %v4196_v22 = vpop.f32.mrf.mxu1 }
 0x191   :  { %v4748_v23 = vadd.f32 %v4196_v22, %v130_v21 }
 0x192   :  { %v203_v24 = vpop.f32.mrf.mxu1 }
 0x193   :  { %603 = vrot.lane.b32.xlu0 %v4748_v23, %s4628_s26  ;;  %525 = vrot.lane.b32.xlu1 %v4748_v23, %s4629_s27  ;;  %v4754_v25 = vadd.f32 %v203_v24, %v130_v21 }
 0x197   :  { %290 = vrot.lane.b32.xlu1 %v4754_v25, %s4630_s28  ;;  %213 = vrot.lane.b32.xlu0 %v4754_v25, %s4629_s27 }
 0x19b   :  { %370 = vrot.lane.b32.xlu1 %v4754_v25, %s4631_s29  ;;  %292 = vrot.lane.b32.xlu0 %v4754_v25, %s4628_s26 }
 0x19f   :  { %368 = vrot.lane.b32.xlu1 %v4754_v25, %s4632_s30  ;;  %448 = vrot.lane.b32.xlu0 %v4754_v25, %s4633_s8 }
 0x1a3   :  { %601 = vrot.lane.b32.xlu1 %v4748_v23, %s4630_s28  ;;  %446 = vrot.lane.b32.xlu0 %v4754_v25, %s4634_s9 }
 0x1a7   :  { %759 = vrot.lane.b32.xlu1 %v4748_v23, %s4633_s8  ;;  %681 = vrot.lane.b32.xlu0 %v4748_v23, %s4631_s29 }
 0x1ab   :  { %757 = vrot.lane.b32.xlu1 %v4748_v23, %s4634_s9  ;;  %679 = vrot.lane.b32.xlu0 %v4748_v23, %s4632_s30 }
 0x205   :  { %v604_v26 = vpop.permute.xlu0 %603  ;;  %v526_v27 = vpop.permute.xlu1 %525 }
 0x209   :  { %v291_v28 = vpop.permute.xlu1 %290  ;;  %v214_v29 = vpop.permute.xlu0 %213 }
 0x20a   :  { %4198 = vmatpush3.xpose.msk.msra.mxu0 %vm215_vm2, %v214_v29 }
 0x20b   :  { %4207 = vmatprep.subr.mxu0 %v4626_v18 }
 0x20d   :  { %v371_v30 = vpop.permute.xlu1 %370  ;;  %4200 = vmatmul.mubr.msk.f32.vlgmr.msra.gmra.mxu0 %vm215_vm2, %v4754_v25  ;;  %v293_v31 = vpop.permute.xlu0 %292 }
 0x20e   :  { %4203 = vmatpush3.xpose.msk.msra.mxu1 %vm215_vm2, %v293_v31  ;;  %4208 = vmatpush3.xpose.msk.msra.mxu0 %vm215_vm2, %v371_v30 }
 0x20f   :  { %4209 = vmatprep.mubr.msk.f32.mxu0 %vm4627_vm1, %v4626_v18  ;;  %4212 = vmatprep.subr.mxu1 %v4626_v18 }
 0x210   :  { %4217 = vmatprep.subr.mxu0 %v4626_v18 }
 0x211   :  { %v369_v32 = vpop.permute.xlu1 %368  ;;  %4205 = vmatmul.mubr.msk.f32.vlgmr.msra.gmra.mxu1 %vm215_vm2, %v291_v28  ;;  %v449_v33 = vpop.permute.xlu0 %448 }
 0x212   :  { %4210 = vmatmul.mubr.msk.f32.vlgmr.msra.gmra.mxu0 %vm215_vm2, %v369_v32  ;;  %4213 = vmatpush3.xpose.msk.msra.mxu1 %vm215_vm2, %v449_v33 }
 0x213   :  { %4218 = vmatpush3.xpose.msk.msra.mxu0 %vm215_vm2, %v526_v27  ;;  %4214 = vmatprep.mubr.msk.f32.mxu1 %vm4627_vm1, %v4626_v18 }
 0x214   :  { %4219 = vmatprep.mubr.msk.f32.mxu0 %vm4627_vm1, %v4626_v18  ;;  %4222 = vmatprep.subr.mxu1 %v4626_v18 }
 0x215   :  { %v602_v34 = vpop.permute.xlu1 %601  ;;  %v447_v35 = vpop.permute.xlu0 %446  ;;  %4227 = vmatprep.subr.mxu0 %v4626_v18 }
 0x216   :  { %4215 = vmatmul.mubr.msk.f32.vlgmr.msra.gmra.mxu1 %vm215_vm2, %v447_v35  ;;  %4220 = vmatmul.mubr.msk.f32.vlgmr.msra.gmra.mxu0 %vm215_vm2, %v4748_v23 }
 0x217   :  { %4223 = vmatpush3.xpose.msk.msra.mxu1 %vm215_vm2, %v604_v26  ;;  %4224 = vmatprep.mubr.msk.f32.mxu1 %vm4627_vm1, %v4626_v18 }
 0x218   :  { %4232 = vmatprep.subr.mxu1 %v4626_v18  ;;  %4229 = vmatprep.mubr.msk.f32.mxu0 %vm4627_vm1, %v4626_v18 }
 0x219   :  { %v760_v36 = vpop.permute.xlu1 %759  ;;  %v682_v37 = vpop.permute.xlu0 %681 }
 0x21a   :  { %4225 = vmatmul.mubr.msk.f32.vlgmr.msra.gmra.mxu1 %vm215_vm2, %v602_v34  ;;  %4228 = vmatpush3.xpose.msk.msra.mxu0 %vm215_vm2, %v682_v37 }
 0x21b   :  { %4233 = vmatpush3.xpose.msk.msra.mxu1 %vm215_vm2, %v760_v36  ;;  %4234 = vmatprep.mubr.msk.f32.mxu1 %vm4627_vm1, %v4626_v18 }
 0x21c   :  { %4237 = vmatprep.subr.mxu0 %v4626_v18  ;;  %4242 = vmatprep.subr.mxu1 %v4626_v18 }
 0x21d   :  { %v758_v38 = vpop.permute.xlu1 %757  ;;  %v680_v39 = vpop.permute.xlu0 %679 }
 0x21e   :  { %4230 = vmatmul.mubr.msk.f32.vlgmr.msra.gmra.mxu0 %vm215_vm2, %v680_v39  ;;  %4235 = vmatmul.mubr.msk.f32.vlgmr.msra.gmra.mxu1 %vm215_vm2, %v758_v38 }
 0x21f   :  { %4239 = vmatprep.mubr.msk.f32.mxu0 %vm4627_vm1, %v4626_v18  ;;  %4244 = vmatprep.mubr.msk.f32.mxu1 %vm4627_vm1, %v4626_v18 }
 0x2cd   :  { %v286_v40 = vpop.f32.mrf.mxu0 }
 0x2ce   :  { %v835_v41 = vmul.f32 0.35355338, %v286_v40 }
 0x2cf   :  { %v4201_v42 = vpop.f32.mrf.mxu0 }
 0x2d0   :  { %v843_v43 = vsel %vm215_vm2, %v835_v41, -inf }
 0x2d1   :  { %844 = vmax.xlane.f32.xlu0 %v843_v43  ;;  %v364_v44 = vpop.f32.mrf.mxu1 }
 0x2d2   :  { %v836_v45 = vmul.f32 0.35355338, %v364_v44  ;;  %v442_v46 = vpop.f32.mrf.mxu0 }
 0x2d3   :  { %v837_v47 = vmul.f32 0.35355338, %v442_v46  ;;  %v4206_v48 = vpop.f32.mrf.mxu1 }
 0x2d4   :  { %v4211_v49 = vpop.f32.mrf.mxu0  ;;  %v846_v50 = vsel %vm215_vm2, %v836_v45, -inf }
 0x2d5   :  { %847 = vmax.xlane.f32.xlu1 %v846_v50  ;;  %v849_v51 = vsel %vm215_vm2, %v837_v47, -inf }
 0x2d6   :  { %850 = vmax.xlane.f32.xlu0 %v849_v51  ;;  %v520_v52 = vpop.f32.mrf.mxu1  ;;  %v597_v53 = vpop.f32.mrf.mxu0 }
 0x2d7   :  { %v838_v54 = vmul.f32 0.35355338, %v520_v52  ;;  %v839_v55 = vmul.f32 0.35355338, %v597_v53 }
 0x2d8   :  { %v4216_v56 = vpop.f32.mrf.mxu1  ;;  %v4221_v57 = vpop.f32.mrf.mxu0 }
 0x2d9   :  { %v855_v58 = vsel %vm215_vm2, %v839_v55, -inf  ;;  %v852_v59 = vsel %vm215_vm2, %v838_v54, -inf }
 0x2da   :  { %856 = vmax.xlane.f32.xlu1 %v855_v58  ;;  %853 = vmax.xlane.f32.xlu0 %v852_v59  ;;  %v675_v60 = vpop.f32.mrf.mxu1 }
 0x2db   :  { %v840_v61 = vmul.f32 0.35355338, %v675_v60 }
 0x2dc   :  { %v4226_v62 = vpop.f32.mrf.mxu1 }
 0x2dd   :  { %v858_v63 = vsel %vm215_vm2, %v840_v61, -inf }
 0x2de   :  { %859 = vmax.xlane.f32.xlu0 %v858_v63  ;;  %v753_v0 = vpop.f32.mrf.mxu0  ;;  %v831_v1 = vpop.f32.mrf.mxu1 }
 0x2df   :  { %v841_v2 = vmul.f32 0.35355338, %v753_v0  ;;  %v842_v3 = vmul.f32 0.35355338, %v831_v1 }
 0x2e0   :  { %v4231_v4 = vpop.f32.mrf.mxu0  ;;  %v4236_v5 = vpop.f32.mrf.mxu1 }
 0x2e1   :  { %v864_v6 = vsel %vm215_vm2, %v842_v3, -inf  ;;  %v861_v7 = vsel %vm215_vm2, %v841_v2, -inf }
 0x2e2   :  { %865 = vmax.xlane.f32.xlu0 %v864_v6  ;;  %862 = vmax.xlane.f32.xlu1 %v861_v7 }
 0x2f3   :  { %931 = vrot.lane.b32.xlu1 %v4754_v25, %s4635_s10 }
 0x2f7   :  { %1083 = vrot.lane.b32.xlu1 %v4754_v25, %s4636_s11 }
 0x2f8   :  { %1007 = vrot.lane.b32.xlu0 %v4754_v25, %s4637_s12 }
 0x2fb   :  { %1159 = vrot.lane.b32.xlu1 %v4754_v25, %s4638_s13 }
 0x2fc   :  { %1252 = vrot.lane.b32.xlu0 %v4748_v23, %s4635_s10 }
 0x2ff   :  { %1328 = vrot.lane.b32.xlu1 %v4748_v23, %s4637_s12 }
 0x35a   :  { %v845_v8 = vpop.xlane.xlu0 %844 }
 0x35b   :  { %v867_v9 = vsub.f32 %v835_v41, %v845_v8 }
 0x35d   :  { %v875_v10 = vmul.f32 1.442695, %v867_v9 }
 0x35e   :  { %v848_v11 = vpop.xlane.xlu1 %847 }
 0x35f   :  { %4520 = vpow2.f32 %v875_v10  ;;  %v868_v12 = vsub.f32 %v836_v45, %v848_v11  ;;  %v851_v13 = vpop.xlane.xlu0 %850 }
 0x360   :  { %v869_v16 = vsub.f32 %v837_v47, %v851_v13 }
 0x361   :  { %v877_v21 = vmul.f32 1.442695, %v868_v12 }
 0x362   :  { %v879_v22 = vmul.f32 1.442695, %v869_v16 }
 0x363   :  { %4522 = vpow2.f32 %v877_v21  ;;  %v857_v24 = vpop.xlane.xlu1 %856  ;;  %v854_v26 = vpop.xlane.xlu0 %853 }
 0x364   :  { %4524 = vpow2.f32 %v879_v22  ;;  %v871_v25 = vsub.f32 %v839_v55, %v857_v24  ;;  %v870_v27 = vsub.f32 %v838_v54, %v854_v26 }
 0x366   :  { %v883_v28 = vmul.f32 1.442695, %v871_v25  ;;  %v881_v29 = vmul.f32 1.442695, %v870_v27 }
 0x367   :  { %v860_v30 = vpop.xlane.xlu0 %859 }
 0x368   :  { %4526 = vpow2.f32 %v883_v28  ;;  %v872_v31 = vsub.f32 %v840_v61, %v860_v30 }
 0x369   :  { %4528 = vpow2.f32 %v881_v29  ;;  %v1574_v29 = vld [vmem:[%s5364_s2 + $0x18] sm:$0xff] }
 0x36a   :  { %v885_v32 = vmul.f32 1.442695, %v872_v31 }
 0x36b   :  { %v863_v33 = vpop.xlane.xlu1 %862  ;;  %v866_v34 = vpop.xlane.xlu0 %865 }
 0x36c   :  { %v4521_v35 = vpop.eup %4520  ;;  %4530 = vpow2.f32 %v885_v32  ;;  %v873_v36 = vsub.f32 %v841_v2, %v863_v33  ;;  %v874_v37 = vsub.f32 %v842_v3, %v866_v34  ;;  %v1573_v32 = vld [vmem:[%s5364_s2 + $0x10] sm:$0xff]  ;;  %v1572_v33 = vld [vmem:[%s5364_s2 + $0x8] sm:$0xff] }
 0x36d   :  { %v891_v38 = vsel %vm215_vm2, %v4521_v35, 0.0 }
 0x36e   :  { %v887_v39 = vmul.f32 1.442695, %v873_v36  ;;  %v889_v40 = vmul.f32 1.442695, %v874_v37  ;;  %892 = vadd.xlane.f32.xlu1 %v891_v38  ;;  %v1571_v37 = vld [vmem:[%s5364_s2] sm:$0xff] }
 0x36f   :  { %v932_v41 = vpop.permute.xlu1 %931  ;;  %v1008_v42 = vpop.permute.xlu0 %1007 }
 0x370   :  { %v4523_v43 = vpop.eup %4522  ;;  %4532 = vpow2.f32 %v887_v39  ;;  %4238 = vmatpush3.msra.mxu0 %v932_v41  ;;  %4243 = vmatpush3.msra.mxu1 %v1008_v42 }
 0x371   :  { %v4525_v44 = vpop.eup %4524  ;;  %4534 = vpow2.f32 %v889_v40  ;;  %v894_v45 = vsel %vm215_vm2, %v4523_v43, 0.0  ;;  %4247 = vmatprep.subr.mxu0 %v4626_v18  ;;  %4252 = vmatprep.subr.mxu1 %v4626_v18 }
 0x372   :  { %895 = vadd.xlane.f32.xlu0 %v894_v45  ;;  %v897_v46 = vsel %vm215_vm2, %v4525_v44, 0.0 }
 0x373   :  { %898 = vadd.xlane.f32.xlu1 %v897_v46  ;;  %v1084_v57 = vpop.permute.xlu1 %1083  ;;  %v1253_v60 = vpop.permute.xlu0 %1252 }
 0x375   :  { %v4527_v47 = vpop.eup %4526 }
 0x376   :  { %v4529_v48 = vpop.eup %4528  ;;  %v903_v49 = vsel %vm215_vm2, %v4527_v47, 0.0 }
 0x377   :  { %904 = vadd.xlane.f32.xlu1 %v903_v49  ;;  %v900_v50 = vsel %vm215_vm2, %v4529_v48, 0.0  ;;  %v1160_v58 = vpop.permute.xlu1 %1159 }
 0x378   :  { %901 = vadd.xlane.f32.xlu0 %v900_v50 }
 0x379   :  { %v4531_v51 = vpop.eup %4530 }
 0x37a   :  { %v906_v52 = vsel %vm215_vm2, %v4531_v51, 0.0 }
 0x37b   :  { %v1329_v59 = vpop.permute.xlu1 %1328 }
 0x37c   :  { %907 = vadd.xlane.f32.xlu0 %v906_v52 }
 0x37d   :  { %v4850_v53 = vpop.eup %4532 }
 0x37e   :  { %v4852_v54 = vpop.eup %4534  ;;  %v909_v55 = vsel %vm215_vm2, %v4850_v53, 0.0 }
 0x37f   :  { %910 = vadd.xlane.f32.xlu1 %v909_v55  ;;  %v912_v56 = vsel %vm215_vm2, %v4852_v54, 0.0 }
 0x380   :  { %913 = vadd.xlane.f32.xlu0 %v912_v56 }
 0x390   :  { %1480 = vrot.lane.b32.xlu1 %v4748_v23, %s4638_s13 }
 0x396   :  { %1404 = vrot.lane.b32.xlu0 %v4748_v23, %s4636_s11 }
 0x3f7   :  { %v893_v61 = vpop.xlane.xlu1 %892 }
 0x3f8   :  { %4536 = vrcp.f32 %v893_v61  ;;  %v1577_v61 = vsub.s32 1, %v4730_v17 }
 0x3fb   :  { %v896_v62 = vpop.xlane.xlu0 %895 }
 0x3fc   :  { %4538 = vrcp.f32 %v896_v62  ;;  %v899_v63 = vpop.xlane.xlu1 %898  ;;  %v1578_v62 = vrot.slane %v4740_v20, %v1577_v61 }
 0x3fd   :  { %4540 = vrcp.f32 %v899_v63 }
 0x400   :  { %v905_v0 = vpop.xlane.xlu1 %904 }
 0x401   :  { %4542 = vrcp.f32 %v905_v0  ;;  %v902_v1 = vpop.xlane.xlu0 %901 }
 0x402   :  { %4544 = vrcp.f32 %v902_v1 }
 0x405   :  { %v4537_v2 = vpop.eup %4536  ;;  %v908_v3 = vpop.xlane.xlu0 %907 }
 0x406   :  { %4546 = vrcp.f32 %v908_v3  ;;  %v916_v4 = vmul.f32 %v4537_v2, %v4521_v35 }
 0x408   :  { %4240 = vmatmul.mubr.msk.f32.vlgmr.msra.gmra.mxu0 %vm215_vm2, %v916_v4  ;;  %v911_v23 = vpop.xlane.xlu1 %910 }
 0x409   :  { %v4539_v5 = vpop.eup %4538  ;;  %4248 = vmatpush3.msra.mxu0 %v1084_v57  ;;  %4548 = vrcp.f32 %v911_v23  ;;  %v914_v6 = vpop.xlane.xlu0 %913  ;;  %4249 = vmatprep.mubr.msk.f32.mxu0 %vm4627_vm1, %v4626_v18 }
 0x40a   :  { %v4541_v7 = vpop.eup %4540  ;;  %4550 = vrcp.f32 %v914_v6  ;;  %4257 = vmatprep.subr.mxu0 %v4626_v18  ;;  %v918_v8 = vmul.f32 %v4539_v5, %v4523_v43 }
 0x40b   :  { %v920_v9 = vmul.f32 %v4541_v7, %v4525_v44 }
 0x40c   :  { %4245 = vmatmul.mubr.msk.f32.vlgmr.msra.gmra.mxu1 %vm215_vm2, %v918_v8  ;;  %v1481_v26 = vpop.permute.xlu1 %1480 }
 0x40d   :  { %4253 = vmatpush3.msra.mxu1 %v1160_v58  ;;  %4250 = vmatmul.mubr.msk.f32.vlgmr.msra.gmra.mxu0 %vm215_vm2, %v920_v9  ;;  %v1405_v16 = vpop.permute.xlu0 %1404 }
 0x40e   :  { %v4543_v10 = vpop.eup %4542  ;;  %4258 = vmatpush3.msra.mxu0 %v1253_v60  ;;  %4254 = vmatprep.mubr.msk.f32.mxu1 %vm4627_vm1, %v4626_v18 }
 0x40f   :  { %v4545_v11 = vpop.eup %4544  ;;  %4259 = vmatprep.mubr.msk.f32.mxu0 %vm4627_vm1, %v4626_v18  ;;  %4262 = vmatprep.subr.mxu1 %v4626_v18  ;;  %v924_v12 = vmul.f32 %v4543_v10, %v4527_v47 }
 0x410   :  { %4267 = vmatprep.subr.mxu0 %v4626_v18  ;;  %v922_v13 = vmul.f32 %v4545_v11, %v4529_v48 }
 0x411   :  { %4260 = vmatmul.mubr.msk.f32.vlgmr.msra.gmra.mxu0 %vm215_vm2, %v924_v12 }
 0x412   :  { %4255 = vmatmul.mubr.msk.f32.vlgmr.msra.gmra.mxu1 %vm215_vm2, %v922_v13  ;;  %4268 = vmatpush3.msra.mxu0 %v1405_v16  ;;  %v1704_v16 = vld [vmem:[%s5365_s3 + $0x18] sm:$0xff] }
 0x413   :  { %v4547_v21 = vpop.eup %4546  ;;  %4263 = vmatpush3.msra.mxu1 %v1329_v59  ;;  %4264 = vmatprep.mubr.msk.f32.mxu1 %vm4627_vm1, %v4626_v18 }
 0x414   :  { %4272 = vmatprep.subr.mxu1 %v4626_v18  ;;  %v926_v22 = vmul.f32 %v4547_v21, %v4531_v51  ;;  %4269 = vmatprep.mubr.msk.f32.mxu0 %vm4627_vm1, %v4626_v18  ;;  %v1703_v21 = vld [vmem:[%s5365_s3 + $0x10] sm:$0xff] }
 0x415   :  { %4277 = vmatprep.subr.mxu0 %v1574_v29 }
 0x416   :  { %v4549_v24 = vpop.eup %4548  ;;  %4265 = vmatmul.mubr.msk.f32.vlgmr.msra.gmra.mxu1 %vm215_vm2, %v926_v22  ;;  %v1702_v22 = vld [vmem:[%s5365_s3 + $0x8] sm:$0xff] }
 0x417   :  { %v4551_v25 = vpop.eup %4550  ;;  %4273 = vmatpush3.msra.mxu1 %v1481_v26  ;;  %4274 = vmatprep.mubr.msk.f32.mxu1 %vm4627_vm1, %v4626_v18  ;;  %v928_v27 = vmul.f32 %v4549_v24, %v4850_v53  ;;  %v1701_v24 = vld [vmem:[%s5365_s3] sm:$0xff]  ;;  %v1807_v26 = vld [vmem:[%s5366_s4 + $0x78] sm:$0xff] }
 0x418   :  { %v930_v28 = vmul.f32 %v4551_v25, %v4852_v54  ;;  %4288 = vmatprep.subr.mxu1 %v1704_v16  ;;  %v1806_v25 = vld [vmem:[%s5366_s4 + $0x70] sm:$0xff] }
 0x419   :  { %4270 = vmatmul.mubr.msk.f32.vlgmr.msra.gmra.mxu0 %vm215_vm2, %v928_v27  ;;  %v1805_v27 = vld [vmem:[%s5366_s4 + $0x68] sm:$0xff] }
 0x41a   :  { %4275 = vmatmul.mubr.msk.f32.vlgmr.msra.gmra.mxu1 %vm215_vm2, %v930_v28  ;;  %4278 = vmatpush3.msra.mxu0 %v1574_v29  ;;  %v1804_v28 = vld [vmem:[%s5366_s4 + $0x60] sm:$0xff]  ;;  %v1803_v29 = vld [vmem:[%s5366_s4 + $0x58] sm:$0xff] }
 0x41b   :  { %4279 = vmatprep.subr.mxu0 %v1573_v32  ;;  %4289 = vmatpush3.msra.mxu1 %v1704_v16 }
 0x41c   :  { %4280 = vmatpush3.msra.mxu0 %v1573_v32  ;;  %4290 = vmatprep.subr.mxu1 %v1703_v21  ;;  %v1800_v32 = vld [vmem:[%s5366_s4 + $0x40] sm:$0xff] }
 0x41d   :  { %4281 = vmatprep.subr.mxu0 %v1572_v33  ;;  %4291 = vmatpush3.msra.mxu1 %v1703_v21 }
 0x41e   :  { %4282 = vmatpush3.msra.mxu0 %v1572_v33  ;;  %4292 = vmatprep.subr.mxu1 %v1702_v22  ;;  %v1799_v33 = vld [vmem:[%s5366_s4 + $0x38] sm:$0xff] }
 0x41f   :  { %4283 = vmatprep.subr.mxu0 %v1571_v37  ;;  %4293 = vmatpush3.msra.mxu1 %v1702_v22 }
 0x420   :  { %4284 = vmatpush3.msra.mxu0 %v1571_v37  ;;  %4294 = vmatprep.subr.mxu1 %v1701_v24 }
 0x421   :  { %4295 = vmatpush3.msra.mxu1 %v1701_v24  ;;  %4299 = vmatprep.subr.mxu0 %v1807_v26 }
 0x4c8   :  { %v1003_v30 = vpop.f32.mrf.mxu0 }
 0x4ca   :  { %v4241_v31 = vpop.f32.mrf.mxu0 }
 0x4cb   :  { %v1801_v31 = vld [vmem:[%s5366_s4 + $0x48] sm:$0xff] }
 0x4cc   :  { %v1079_v34 = vpop.f32.mrf.mxu1 }
 0x4cd   :  { %v1155_v35 = vpop.f32.mrf.mxu0  ;;  %1236 = vrot.lane.b32.xlu0 %v1079_v34, %s4639_s19  ;;  %v1798_v34 = vld [vmem:[%s5366_s4 + $0x30] sm:$0xff] }
 0x4ce   :  { %1240 = vrot.lane.b32.xlu1 %v1155_v35, %s4640_s20  ;;  %v4246_v36 = vpop.f32.mrf.mxu1  ;;  %v1797_v35 = vld [vmem:[%s5366_s4 + $0x28] sm:$0xff] }
 0x4cf   :  { %v4251_v38 = vpop.f32.mrf.mxu0  ;;  %v1796_v36 = vld [vmem:[%s5366_s4 + $0x20] sm:$0xff] }
 0x4d1   :  { %v1324_v39 = vpop.f32.mrf.mxu0 }
 0x4d2   :  { %v1231_v40 = vpop.f32.mrf.mxu1 }
 0x4d3   :  { %1244 = vrot.lane.b32.xlu1 %v1231_v40, %s4641_s23  ;;  %v4261_v41 = vpop.f32.mrf.mxu0 }
 0x4d4   :  { %v4256_v42 = vpop.f32.mrf.mxu1 }
 0x4d6   :  { %v1400_v43 = vpop.f32.mrf.mxu1 }
 0x4d7   :  { %1557 = vrot.lane.b32.xlu0 %v1400_v43, %s4639_s19  ;;  %v1691_v43 = vsub.s32 2, %v4730_v17 }
 0x4d8   :  { %v4266_v44 = vpop.f32.mrf.mxu1 }
 0x4d9   :  { %v1476_v45 = vpop.f32.mrf.mxu0  ;;  %v1697_v44 = vsub.s32 3, %v4730_v17 }
 0x4da   :  { %v1552_v46 = vpop.f32.mrf.mxu1 }
 0x4db   :  { %1565 = vrot.lane.b32.xlu1 %v1552_v46, %s4641_s23  ;;  %1561 = vrot.lane.b32.xlu0 %v1476_v45, %s4640_s20  ;;  %v4271_v47 = vpop.f32.mrf.mxu0  ;;  %v1692_v45 = vrot.slane %v4740_v20, %v1691_v43 }
 0x4dc   :  { %v4276_v48 = vpop.f32.mrf.mxu1 }
 0x4dd   :  { %v1698_v48 = vrot.slane %v4740_v20, %v1697_v44 }
 0x53f   :  { %v1237_v49 = vpop.permute.xlu0 %1236 }
 0x540   :  { %v1241_v50 = vpop.permute.xlu1 %1240  ;;  %v1247_v51 = vsel %vm215_vm2, %v1003_v30, %v1237_v49  ;;  %v1802_v30 = vld [vmem:[%s5366_s4 + $0x50] sm:$0xff] }
 0x541   :  { %v1249_v52 = vsel %vm1248_vm3, %v1247_v51, %v1241_v50 }
 0x545   :  { %v1245_v53 = vpop.permute.xlu1 %1244 }
 0x546   :  { %v1251_v54 = vsel %vm1250_vm4, %v1249_v52, %v1245_v53 }
 0x547   :  { %4285 = vmatprep.mubr.msk.f32.mxu0 %vm40_vm0, %v1251_v54 }
 0x549   :  { %v1558_v55 = vpop.permute.xlu0 %1557 }
 0x54a   :  { %v1568_v56 = vsel %vm215_vm2, %v1324_v39, %v1558_v55  ;;  %v1795_v55 = vld [vmem:[%s5366_s4 + $0x18] sm:$0xff] }
 0x54d   :  { %v1566_v57 = vpop.permute.xlu1 %1565  ;;  %v1562_v58 = vpop.permute.xlu0 %1561 }
 0x54e   :  { %v1569_v59 = vsel %vm1248_vm3, %v1568_v56, %v1562_v58  ;;  %v1794_v56 = vld [vmem:[%s5366_s4 + $0x10] sm:$0xff]  ;;  %v1792_v58 = vld [vmem:[%s5366_s4] sm:$0xff] }
 0x54f   :  { %v1570_v60 = vsel %vm1250_vm4, %v1569_v59, %v1566_v57  ;;  %v1793_v57 = vld [vmem:[%s5366_s4 + $0x8] sm:$0xff]  ;;  %v1707_v59 = vsub.s32 4, %v4730_v17 }
 0x550   :  { %4286 = vmatmul.mubr.msk.f32.vlgmr.msra.gmra.mxu0 %vm40_vm0, %v1570_v60 }
 0x551   :  { %4300 = vmatpush3.msra.mxu0 %v1807_v26  ;;  %v1708_v60 = vrot.slane %v4740_v20, %v1707_v59 }
 0x552   :  { %4301 = vmatprep.subr.mxu0 %v1806_v25 }
 0x553   :  { %4302 = vmatpush3.msra.mxu0 %v1806_v25 }
 0x554   :  { %4303 = vmatprep.subr.mxu0 %v1805_v27 }
 0x555   :  { %4304 = vmatpush3.msra.mxu0 %v1805_v27 }
 0x556   :  { %4305 = vmatprep.subr.mxu0 %v1804_v28 }
 0x557   :  { %4306 = vmatpush3.msra.mxu0 %v1804_v28  ;;  %v3963_v28 = vld [vmem:[%s5363_s1 + $0x38] sm:$0xff] }
 0x558   :  { %4307 = vmatprep.subr.mxu0 %v1803_v29  ;;  %4334 = vmatprep.subr.mxu1 %v3963_v28 }
 0x559   :  { %4308 = vmatpush3.msra.mxu0 %v1803_v29  ;;  %v3962_v29 = vld [vmem:[%s5363_s1 + $0x30] sm:$0xff] }
 0x55a   :  { %4309 = vmatprep.subr.mxu0 %v1802_v30 }
 0x55b   :  { %4310 = vmatpush3.msra.mxu0 %v1802_v30  ;;  %v3961_v30 = vld [vmem:[%s5363_s1 + $0x28] sm:$0xff] }
 0x55c   :  { %4311 = vmatprep.subr.mxu0 %v1801_v31 }
 0x55d   :  { %4312 = vmatpush3.msra.mxu0 %v1801_v31  ;;  %v3960_v31 = vld [vmem:[%s5363_s1 + $0x20] sm:$0xff] }
 0x55e   :  { %4313 = vmatprep.subr.mxu0 %v1800_v32 }
 0x55f   :  { %4314 = vmatpush3.msra.mxu0 %v1800_v32 }
 0x560   :  { %4315 = vmatprep.subr.mxu0 %v1799_v33 }
 0x561   :  { %4316 = vmatpush3.msra.mxu0 %v1799_v33 }
 0x562   :  { %4317 = vmatprep.subr.mxu0 %v1798_v34 }
 0x563   :  { %4318 = vmatpush3.msra.mxu0 %v1798_v34 }
 0x564   :  { %4319 = vmatprep.subr.mxu0 %v1797_v35 }
 0x565   :  { %4320 = vmatpush3.msra.mxu0 %v1797_v35 }
 0x566   :  { %4321 = vmatprep.subr.mxu0 %v1796_v36 }
 0x567   :  { %4322 = vmatpush3.msra.mxu0 %v1796_v36 }
 0x568   :  { %4323 = vmatprep.subr.mxu0 %v1795_v55 }
 0x569   :  { %4324 = vmatpush3.msra.mxu0 %v1795_v55 }
 0x56a   :  { %4325 = vmatprep.subr.mxu0 %v1794_v56 }
 0x56b   :  { %4326 = vmatpush3.msra.mxu0 %v1794_v56 }
 0x56c   :  { %4327 = vmatprep.subr.mxu0 %v1793_v57 }
 0x56d   :  { %4328 = vmatpush3.msra.mxu0 %v1793_v57 }
 0x56e   :  { %4329 = vmatprep.subr.mxu0 %v1792_v58 }
 0x56f   :  { %4330 = vmatpush3.msra.mxu0 %v1792_v58 }
 0x570   :  { %4375 = vmatprep.subr.mxu0 %v4626_v18 }
 0x610   :  { %v4287_v63 = vpop.f32.mrf.mxu0 }
 0x611   :  { %v1657_v0 = vadd.f32 %v4287_v63, %v1578_v62 }
 0x612   :  { %v1651_v1 = vpop.f32.mrf.mxu0 }
 0x613   :  { %v1652_v2 = vadd.f32 %v1651_v1, %v1578_v62  ;;  %v1661_v3 = vadd.f32 %v1657_v0, %v4724_v15 }
 0x615   :  { %v1665_v4 = vsel %vm40_vm0, %v1661_v3, 0.0  ;;  %v1660_v23 = vadd.f32 %v1652_v2, %v4722_v14 }
 0x616   :  { %1666 = vadd.xlane.f32.xlu1 %v1665_v4  ;;  %v1810_v4 = vsub.s32 5, %v4730_v17 }
 0x617   :  { %v1662_v5 = vsel %vm40_vm0, %v1660_v23, 0.0 }
 0x618   :  { %1663 = vadd.xlane.f32.xlu0 %v1662_v5 }
 0x69f   :  { %v1667_v6 = vpop.xlane.xlu1 %1666 }
 0x6a0   :  { %v1670_v7 = vmul.f32 0.03125, %v1667_v6 }
 0x6a1   :  { %v1664_v8 = vpop.xlane.xlu0 %1663 }
 0x6a2   :  { %v1669_v9 = vmul.f32 0.03125, %v1664_v8  ;;  %v4922_v10 = vsub.f32 %v1661_v3, %v1670_v7 }
 0x6a4   :  { %v4924_v11 = vsub.f32 %v1660_v23, %v1669_v9  ;;  %v1674_v14 = vmul.f32 %v4922_v10, %v4922_v10  ;;  %v1811_v23 = vrot.slane %v4740_v20, %v1810_v4 }
 0x6a6   :  { %v1673_v12 = vmul.f32 %v4924_v11, %v4924_v11  ;;  %v1678_v13 = vsel %vm40_vm0, %v1674_v14, 0.0 }
 0x6a8   :  { %v1675_v15 = vsel %vm40_vm0, %v1673_v12, 0.0 }
 0x6a9   :  { %1676 = vadd.xlane.f32.xlu0 %v1675_v15 }
 0x6ad   :  { %1679 = vadd.xlane.f32.xlu0 %v1678_v13 }
 0x732   :  { %v1677_v37 = vpop.xlane.xlu0 %1676 }
 0x733   :  { %v1681_v38 = vmul.f32 0.03125, %v1677_v37 }
 0x735   :  { %v1683_v39 = vadd.f32 1e-05, %v1681_v38  ;;  %v1917_v38 = vsub.s32 6, %v4730_v17 }
 0x736   :  { %v1680_v40 = vpop.xlane.xlu0 %1679 }
 0x737   :  { %4552 = vrsqrt.f32 %v1683_v39  ;;  %v1682_v41 = vmul.f32 0.03125, %v1680_v40  ;;  %v1918_v40 = vrot.slane %v4740_v20, %v1917_v38 }
 0x739   :  { %v1684_v42 = vadd.f32 1e-05, %v1682_v41  ;;  %v1923_v41 = vsub.s32 7, %v4730_v17 }
 0x73b   :  { %4554 = vrsqrt.f32 %v1684_v42 }
 0x744   :  { %v4553_v46 = vpop.eup %4552 }
 0x745   :  { %v1687_v47 = vmul.f32 %v4553_v46, %v4924_v11 }
 0x747   :  { %v1693_v49 = vmul.f32 %v1692_v45, %v1687_v47 }
 0x748   :  { %v4555_v50 = vpop.eup %4554 }
 0x749   :  { %v1688_v51 = vmul.f32 %v4555_v50, %v4922_v10  ;;  %v1699_v52 = vadd.f32 %v1698_v48, %v1693_v49 }
 0x74b   :  { %v1694_v53 = vmul.f32 %v1692_v45, %v1688_v51  ;;  %4296 = vmatprep.mubr.msk.f32.mxu1 %vm40_vm0, %v1699_v52 }
 0x74d   :  { %v1700_v54 = vadd.f32 %v1698_v48, %v1694_v53  ;;  %v1924_v48 = vrot.slane %v4740_v20, %v1923_v41 }
 0x74f   :  { %4297 = vmatmul.mubr.msk.f32.vlgmr.msra.gmra.mxu1 %vm40_vm0, %v1700_v54 }
 0x750   :  { %4335 = vmatpush3.msra.mxu1 %v3963_v28 }
 0x751   :  { %4336 = vmatprep.subr.mxu1 %v3962_v29 }
 0x752   :  { %4337 = vmatpush3.msra.mxu1 %v3962_v29 }
 0x753   :  { %4338 = vmatprep.subr.mxu1 %v3961_v30 }
 0x754   :  { %4339 = vmatpush3.msra.mxu1 %v3961_v30 }
 0x755   :  { %4340 = vmatprep.subr.mxu1 %v3960_v31 }
 0x756   :  { %4341 = vmatpush3.msra.mxu1 %v3960_v31 }
 0x757   :  { %4345 = vmatprep.subr.mxu1 %v4626_v18 }
 0x80f   :  { %v4298_v62 = vpop.f32.mrf.mxu1 }
 0x810   :  { %v1787_v63 = vadd.f32 %v4298_v62, %v1708_v60 }
 0x811   :  { %v1781_v0 = vpop.f32.mrf.mxu1 }
 0x812   :  { %v1782_v1 = vadd.f32 %v1781_v0, %v1708_v60  ;;  %v1791_v3 = vmax.f32 %v1787_v63, 0.0 }
 0x814   :  { %v1790_v2 = vmax.f32 %v1782_v1, 0.0 }
 0x816   :  { %4331 = vmatprep.mubr.f32.mxu0 %v1790_v2 }
 0x817   :  { %4332 = vmatmul.mubr.f32.vlgmr.msra.gmra.mxu0 %v1791_v3 }
 0x818   :  { %4377 = vmatprep.mubr.msk.f32.mxu0 %vm4627_vm1, %v4626_v18 }
 0x8d7   :  { %v4333_v5 = vpop.f32.mrf.mxu0 }
 0x8d8   :  { %v1884_v6 = vadd.f32 %v4333_v5, %v1811_v23 }
 0x8d9   :  { %v1878_v7 = vpop.f32.mrf.mxu0 }
 0x8da   :  { %v1879_v8 = vadd.f32 %v1878_v7, %v1811_v23  ;;  %v1888_v9 = vadd.f32 %v1884_v6, %v1700_v54 }
 0x8dc   :  { %v1892_v10 = vsel %vm40_vm0, %v1888_v9, 0.0  ;;  %v1887_v11 = vadd.f32 %v1879_v8, %v1699_v52  ;;  %v5053_v52 = vld [vmem:[%s5367_s5 + $0x8] sm:$0xff] }
 0x8dd   :  { %1893 = vadd.xlane.f32.xlu0 %v1892_v10  ;;  %v1937_v53 = vrot.slane %v5053_v52, %v4735_v19 }
 0x8de   :  { %v1889_v12 = vsel %vm40_vm0, %v1887_v11, 0.0 }
 0x8df   :  { %1890 = vadd.xlane.f32.xlu1 %v1889_v12 }
 0x966   :  { %v1894_v15 = vpop.xlane.xlu0 %1893 }
 0x967   :  { %v1896_v14 = vmul.f32 0.03125, %v1894_v15 }
 0x968   :  { %v1891_v13 = vpop.xlane.xlu1 %1890 }
 0x969   :  { %v1898_v16 = vsub.f32 %v1888_v9, %v1896_v14  ;;  %v1895_v21 = vmul.f32 0.03125, %v1891_v13 }
 0x96b   :  { %v1897_v22 = vsub.f32 %v1887_v11, %v1895_v21  ;;  %v1900_v24 = vmul.f32 %v1898_v16, %v1898_v16 }
 0x96d   :  { %v1904_v26 = vsel %vm40_vm0, %v1900_v24, 0.0  ;;  %v1899_v25 = vmul.f32 %v1897_v22, %v1897_v22 }
 0x96e   :  { %1905 = vadd.xlane.f32.xlu0 %v1904_v26 }
 0x96f   :  { %v1901_v27 = vsel %vm40_vm0, %v1899_v25, 0.0 }
 0x970   :  { %1902 = vadd.xlane.f32.xlu1 %v1901_v27 }
 0x9f7   :  { %v1906_v32 = vpop.xlane.xlu0 %1905 }
 0x9f8   :  { %v1908_v33 = vmul.f32 0.03125, %v1906_v32 }
 0x9f9   :  { %v1903_v34 = vpop.xlane.xlu1 %1902 }
 0x9fa   :  { %v1910_v35 = vadd.f32 1e-05, %v1908_v33  ;;  %v1907_v36 = vmul.f32 0.03125, %v1903_v34 }
 0x9fc   :  { %4556 = vrsqrt.f32 %v1910_v35  ;;  %v1909_v37 = vadd.f32 1e-05, %v1907_v36 }
 0x9fe   :  { %4558 = vrsqrt.f32 %v1909_v37 }
 0xa09   :  { %v4557_v39 = vpop.eup %4556 }
 0xa0a   :  { %v1914_v42 = vmul.f32 %v4557_v39, %v1898_v16 }
 0xa0b   :  { %v4559_v45 = vpop.eup %4558 }
 0xa0c   :  { %v1913_v46 = vmul.f32 %v4559_v45, %v1897_v22  ;;  %v1920_v47 = vmul.f32 %v1918_v40, %v1914_v42 }
 0xa0e   :  { %v1919_v49 = vmul.f32 %v1918_v40, %v1913_v46  ;;  %v5042_v51 = vadd.f32 %v1924_v48, %v1920_v47 }
 0xa10   :  { %v5040_v50 = vadd.f32 %v1924_v48, %v1919_v49 }
 0xa12   :  { %4342 = vmatprep.mubr.msk.f32.mxu1 %vm40_vm0, %v5040_v50 }
 0xa13   :  { %4343 = vmatmul.mubr.msk.f32.vlgmr.msra.gmra.mxu1 %vm40_vm0, %v5042_v51 }
 0xa14   :  { %4347 = vmatprep.mubr.msk.f32.mxu1 %vm4627_vm1, %v4626_v18 }
 0xad3   :  { %v4344_v20 = vpop.f32.mrf.mxu1 }
 0xad4   :  { %v5071_v56 = vadd.f32 %v4344_v20, %v1937_v53 }
 0xad5   :  { %v2010_v54 = vpop.f32.mrf.mxu1 }
 0xad6   :  { %v5057_v55 = vadd.f32 %v2010_v54, %v1937_v53 }
 0xad8   :  { %2098 = vrot.lane.b32.xlu0 %v5057_v55, %s4628_s26  ;;  %2020 = vrot.lane.b32.xlu1 %v5057_v55, %s4629_s27 }
 0xadc   :  { %2174 = vrot.lane.b32.xlu0 %v5057_v55, %s4632_s30  ;;  %2096 = vrot.lane.b32.xlu1 %v5057_v55, %s4630_s28 }
 0xae0   :  { %2252 = vrot.lane.b32.xlu0 %v5057_v55, %s4634_s9  ;;  %2176 = vrot.lane.b32.xlu1 %v5057_v55, %s4631_s29 }
 0xae4   :  { %2409 = vrot.lane.b32.xlu0 %v5071_v56, %s4628_s26  ;;  %2254 = vrot.lane.b32.xlu1 %v5057_v55, %s4633_s8 }
 0xae8   :  { %2487 = vrot.lane.b32.xlu0 %v5071_v56, %s4631_s29  ;;  %2331 = vrot.lane.b32.xlu1 %v5071_v56, %s4629_s27 }
 0xaec   :  { %2485 = vrot.lane.b32.xlu0 %v5071_v56, %s4632_s30  ;;  %2407 = vrot.lane.b32.xlu1 %v5071_v56, %s4630_s28 }
 0xaf0   :  { %2565 = vrot.lane.b32.xlu1 %v5071_v56, %s4633_s8 }
 0xaf4   :  { %2563 = vrot.lane.b32.xlu1 %v5071_v56, %s4634_s9 }
 0xb4a   :  { %v2099_v57 = vpop.permute.xlu0 %2098  ;;  %v2021_v58 = vpop.permute.xlu1 %2020 }
 0xb4b   :  { %4346 = vmatpush3.xpose.msk.msra.mxu1 %vm215_vm2, %v2021_v58 }
 0xb4c   :  { %4350 = vmatprep.subr.mxu1 %v4626_v18 }
 0xb4e   :  { %v2175_v60 = vpop.permute.xlu0 %2174  ;;  %4348 = vmatmul.mubr.msk.f32.vlgmr.msra.gmra.mxu1 %vm215_vm2, %v5057_v55  ;;  %v2097_v62 = vpop.permute.xlu1 %2096 }
 0xb4f   :  { %4351 = vmatpush3.xpose.msk.msra.mxu1 %vm215_vm2, %v2099_v57  ;;  %4352 = vmatprep.mubr.msk.f32.mxu1 %vm4627_vm1, %v4626_v18 }
 0xb50   :  { %4355 = vmatprep.subr.mxu1 %v4626_v18 }
 0xb52   :  { %v2253_v63 = vpop.permute.xlu0 %2252  ;;  %4353 = vmatmul.mubr.msk.f32.vlgmr.msra.gmra.mxu1 %vm215_vm2, %v2097_v62  ;;  %v2177_v0 = vpop.permute.xlu1 %2176 }
 0xb53   :  { %4356 = vmatpush3.xpose.msk.msra.mxu1 %vm215_vm2, %v2177_v0  ;;  %4357 = vmatprep.mubr.msk.f32.mxu1 %vm4627_vm1, %v4626_v18 }
 0xb54   :  { %4360 = vmatprep.subr.mxu1 %v4626_v18 }
 0xb56   :  { %v2410_v1 = vpop.permute.xlu0 %2409  ;;  %4358 = vmatmul.mubr.msk.f32.vlgmr.msra.gmra.mxu1 %vm215_vm2, %v2175_v60  ;;  %v2255_v2 = vpop.permute.xlu1 %2254 }
 0xb57   :  { %4361 = vmatpush3.xpose.msk.msra.mxu1 %vm215_vm2, %v2255_v2  ;;  %4362 = vmatprep.mubr.msk.f32.mxu1 %vm4627_vm1, %v4626_v18 }
 0xb58   :  { %4365 = vmatprep.subr.mxu1 %v4626_v18 }
 0xb5a   :  { %v2488_v3 = vpop.permute.xlu0 %2487  ;;  %4363 = vmatmul.mubr.msk.f32.vlgmr.msra.gmra.mxu1 %vm215_vm2, %v2253_v63  ;;  %v2332_v23 = vpop.permute.xlu1 %2331 }
 0xb5b   :  { %4366 = vmatpush3.xpose.msk.msra.mxu1 %vm215_vm2, %v2332_v23  ;;  %4376 = vmatpush3.xpose.msk.msra.mxu0 %vm215_vm2, %v2488_v3 }
 0xb5c   :  { %4367 = vmatprep.mubr.msk.f32.mxu1 %vm4627_vm1, %v4626_v18  ;;  %4370 = vmatprep.subr.mxu1 %v4626_v18 }
 0xb5d   :  { %4385 = vmatprep.subr.mxu0 %v4626_v18 }
 0xb5e   :  { %v2486_v5 = vpop.permute.xlu0 %2485  ;;  %4368 = vmatmul.mubr.msk.f32.vlgmr.msra.gmra.mxu1 %vm215_vm2, %v5071_v56  ;;  %v2408_v6 = vpop.permute.xlu1 %2407 }
 0xb5f   :  { %4371 = vmatpush3.xpose.msk.msra.mxu1 %vm215_vm2, %v2410_v1  ;;  %4378 = vmatmul.mubr.msk.f32.vlgmr.msra.gmra.mxu0 %vm215_vm2, %v2486_v5 }
 0xb60   :  { %4372 = vmatprep.mubr.msk.f32.mxu1 %vm4627_vm1, %v4626_v18  ;;  %4380 = vmatprep.subr.mxu1 %v4626_v18 }
 0xb61   :  { %4387 = vmatprep.mubr.msk.f32.mxu0 %vm4627_vm1, %v4626_v18 }
 0xb62   :  { %4373 = vmatmul.mubr.msk.f32.vlgmr.msra.gmra.mxu1 %vm215_vm2, %v2408_v6  ;;  %v2566_v7 = vpop.permute.xlu1 %2565 }
 0xb63   :  { %4381 = vmatpush3.xpose.msk.msra.mxu1 %vm215_vm2, %v2566_v7  ;;  %4382 = vmatprep.mubr.msk.f32.mxu1 %vm4627_vm1, %v4626_v18 }
 0xb64   :  { %4390 = vmatprep.subr.mxu1 %v4626_v18 }
 0xb66   :  { %v2564_v8 = vpop.permute.xlu1 %2563 }
 0xb67   :  { %4383 = vmatmul.mubr.msk.f32.vlgmr.msra.gmra.mxu1 %vm215_vm2, %v2564_v8 }
 0xb68   :  { %4392 = vmatprep.mubr.msk.f32.mxu1 %vm4627_vm1, %v4626_v18 }
 0xc0e   :  { %v2092_v9 = vpop.f32.mrf.mxu1 }
 0xc0f   :  { %v5131_v10 = vmul.f32 0.35355338, %v2092_v9 }
 0xc10   :  { %v4349_v11 = vpop.f32.mrf.mxu1 }
 0xc11   :  { %v2649_v12 = vsel %vm215_vm2, %v5131_v10, -inf }
 0xc12   :  { %2650 = vmax.xlane.f32.xlu0 %v2649_v12  ;;  %v2170_v15 = vpop.f32.mrf.mxu1 }
 0xc13   :  { %v2642_v14 = vmul.f32 0.35355338, %v2170_v15 }
 0xc14   :  { %v4354_v13 = vpop.f32.mrf.mxu1 }
 0xc15   :  { %v2652_v16 = vsel %vm215_vm2, %v2642_v14, -inf }
 0xc16   :  { %2653 = vmax.xlane.f32.xlu1 %v2652_v16  ;;  %v2248_v21 = vpop.f32.mrf.mxu1 }
 0xc17   :  { %v5136_v22 = vmul.f32 0.35355338, %v2248_v21 }
 0xc18   :  { %v4359_v24 = vpop.f32.mrf.mxu1 }
 0xc19   :  { %v2655_v26 = vsel %vm215_vm2, %v5136_v22, -inf }
 0xc1a   :  { %2656 = vmax.xlane.f32.xlu0 %v2655_v26  ;;  %v2326_v25 = vpop.f32.mrf.mxu1 }
 0xc1b   :  { %v2644_v27 = vmul.f32 0.35355338, %v2326_v25 }
 0xc1c   :  { %v4364_v28 = vpop.f32.mrf.mxu1 }
 0xc1d   :  { %v2658_v29 = vsel %vm215_vm2, %v2644_v27, -inf }
 0xc1e   :  { %2659 = vmax.xlane.f32.xlu0 %v2658_v29  ;;  %v2403_v30 = vpop.f32.mrf.mxu1 }
 0xc1f   :  { %v5141_v31 = vmul.f32 0.35355338, %v2403_v30  ;;  %v2559_v32 = vpop.f32.mrf.mxu0 }
 0xc20   :  { %v4369_v33 = vpop.f32.mrf.mxu1  ;;  %v2647_v34 = vmul.f32 0.35355338, %v2559_v32 }
 0xc21   :  { %v4379_v35 = vpop.f32.mrf.mxu0  ;;  %v2661_v36 = vsel %vm215_vm2, %v5141_v31, -inf }
 0xc22   :  { %2662 = vmax.xlane.f32.xlu1 %v2661_v36  ;;  %v2481_v37 = vpop.f32.mrf.mxu1  ;;  %v2667_v42 = vsel %vm215_vm2, %v2647_v34, -inf }
 0xc23   :  { %v2646_v39 = vmul.f32 0.35355338, %v2481_v37 }
 0xc24   :  { %v4374_v40 = vpop.f32.mrf.mxu1 }
 0xc25   :  { %v2664_v45 = vsel %vm215_vm2, %v2646_v39, -inf }
 0xc26   :  { %2668 = vmax.xlane.f32.xlu1 %v2667_v42  ;;  %2665 = vmax.xlane.f32.xlu0 %v2664_v45 }
 0xc27   :  { %v2637_v46 = vpop.f32.mrf.mxu1 }
 0xc28   :  { %v2648_v47 = vmul.f32 0.35355338, %v2637_v46 }
 0xc29   :  { %v4384_v48 = vpop.f32.mrf.mxu1 }
 0xc2a   :  { %v2670_v49 = vsel %vm215_vm2, %v2648_v47, -inf }
 0xc2b   :  { %2671 = vmax.xlane.f32.xlu0 %v2670_v49 }
 0xc37   :  { %2737 = vrot.lane.b32.xlu1 %v5057_v55, %s4635_s10 }
 0xc3b   :  { %2889 = vrot.lane.b32.xlu1 %v5057_v55, %s4636_s11 }
 0xc3f   :  { %2965 = vrot.lane.b32.xlu1 %v5057_v55, %s4638_s13 }
 0xc41   :  { %2813 = vrot.lane.b32.xlu0 %v5057_v55, %s4637_s12 }
 0xc43   :  { %3132 = vrot.lane.b32.xlu1 %v5071_v56, %s4637_s12 }
 0xc45   :  { %3056 = vrot.lane.b32.xlu0 %v5071_v56, %s4635_s10 }
 0xc9b   :  { %v2651_v20 = vpop.xlane.xlu0 %2650 }
 0xc9c   :  { %v2673_v1 = vsub.f32 %v5131_v10, %v2651_v20 }
 0xc9e   :  { %v2681_v9 = vmul.f32 1.442695, %v2673_v1 }
 0xc9f   :  { %v2654_v53 = vpop.xlane.xlu1 %2653 }
 0xca0   :  { %v2674_v54 = vsub.f32 %v2642_v14, %v2654_v53 }
 0xca2   :  { %v2683_v57 = vmul.f32 1.442695, %v2674_v54 }
 0xca3   :  { %v2657_v58 = vpop.xlane.xlu0 %2656 }
 0xca4   :  { %4560 = vpow2.f32 %v2683_v57  ;;  %v2675_v11 = vsub.f32 %v5136_v22, %v2657_v58 }
 0xca6   :  { %v2685_v10 = vmul.f32 1.442695, %v2675_v11 }
 0xca7   :  { %v2660_v60 = vpop.xlane.xlu0 %2659 }
 0xca8   :  { %v2676_v62 = vsub.f32 %v2644_v27, %v2660_v60 }
 0xcaa   :  { %v2687_v63 = vmul.f32 1.442695, %v2676_v62 }
 0xcab   :  { %v2663_v0 = vpop.xlane.xlu1 %2662 }
 0xcac   :  { %4562 = vpow2.f32 %v2687_v63  ;;  %v2677_v13 = vsub.f32 %v5141_v31, %v2663_v0 }
 0xcae   :  { %v2689_v26 = vmul.f32 1.442695, %v2677_v13 }
 0xcaf   :  { %v2666_v55 = vpop.xlane.xlu0 %2665  ;;  %v2669_v2 = vpop.xlane.xlu1 %2668 }
 0xcb0   :  { %v2678_v3 = vsub.f32 %v2646_v39, %v2666_v55  ;;  %v2679_v23 = vsub.f32 %v2647_v34, %v2669_v2 }
 0xcb1   :  { %v4561_v5 = vpop.eup %4560 }
 0xcb2   :  { %v2691_v6 = vmul.f32 1.442695, %v2678_v3  ;;  %v2693_v7 = vmul.f32 1.442695, %v2679_v23  ;;  %v2700_v8 = vsel %vm215_vm2, %v4561_v5, 0.0 }
 0xcb3   :  { %2701 = vadd.xlane.f32.xlu0 %v2700_v8  ;;  %v2738_v12 = vpop.permute.xlu1 %2737 }
 0xcb4   :  { %4564 = vpow2.f32 %v2691_v6  ;;  %v2672_v15 = vpop.xlane.xlu0 %2671  ;;  %4386 = vmatpush3.msra.mxu0 %v2738_v12 }
 0xcb5   :  { %4566 = vpow2.f32 %v2693_v7  ;;  %v2680_v14 = vsub.f32 %v2648_v47, %v2672_v15  ;;  %4395 = vmatprep.subr.mxu0 %v4626_v18 }
 0xcb6   :  { %4568 = vpow2.f32 %v2681_v9 }
 0xcb7   :  { %v2695_v16 = vmul.f32 1.442695, %v2680_v14  ;;  %v2890_v42 = vpop.permute.xlu1 %2889 }
 0xcb8   :  { %v2814_v21 = vpop.permute.xlu0 %2813 }
 0xcb9   :  { %v4563_v24 = vpop.eup %4562  ;;  %4570 = vpow2.f32 %v2695_v16  ;;  %4391 = vmatpush3.msra.mxu1 %v2814_v21  ;;  %v3993_v16 = vld [vmem:[%s5364_s2 + $0x38] sm:$0xff] }
 0xcba   :  { %v2706_v22 = vsel %vm215_vm2, %v4563_v24, 0.0  ;;  %4400 = vmatprep.subr.mxu1 %v4626_v18  ;;  %4572 = vpow2.f32 %v2685_v10 }
 0xcbb   :  { %2707 = vadd.xlane.f32.xlu0 %v2706_v22  ;;  %4574 = vpow2.f32 %v2689_v26  ;;  %v2966_v45 = vpop.permute.xlu1 %2965  ;;  %v3991_v26 = vld [vmem:[%s5364_s2 + $0x28] sm:$0xff] }
 0xcbc   :  { %v3057_v39 = vpop.permute.xlu0 %3056 }
 0xcbf   :  { %v3133_v47 = vpop.permute.xlu1 %3132 }
 0xcc1   :  { %v4565_v25 = vpop.eup %4564 }
 0xcc2   :  { %v5167_v27 = vpop.eup %4566  ;;  %v2712_v28 = vsel %vm215_vm2, %v4565_v25, 0.0 }
 0xcc3   :  { %2713 = vadd.xlane.f32.xlu0 %v2712_v28  ;;  %v2715_v29 = vsel %vm215_vm2, %v5167_v27, 0.0  ;;  %v4569_v30 = vpop.eup %4568 }
 0xcc4   :  { %2716 = vadd.xlane.f32.xlu1 %v2715_v29  ;;  %v2697_v32 = vsel %vm215_vm2, %v4569_v30, 0.0 }
 0xcc6   :  { %v4571_v31 = vpop.eup %4570 }
 0xcc7   :  { %v2718_v33 = vsel %vm215_vm2, %v4571_v31, 0.0  ;;  %v4573_v34 = vpop.eup %4572 }
 0xcc8   :  { %2698 = vadd.xlane.f32.xlu1 %v2697_v32  ;;  %2719 = vadd.xlane.f32.xlu0 %v2718_v33  ;;  %v2703_v35 = vsel %vm215_vm2, %v4573_v34, 0.0  ;;  %v4575_v36 = vpop.eup %4574 }
 0xcc9   :  { %v2709_v37 = vsel %vm215_vm2, %v4575_v36, 0.0 }
 0xccc   :  { %2704 = vadd.xlane.f32.xlu1 %v2703_v35 }
 0xcd0   :  { %2710 = vadd.xlane.f32.xlu1 %v2709_v37 }
 0xcde   :  { %3208 = vrot.lane.b32.xlu0 %v5071_v56, %s4636_s11 }
 0xce1   :  { %3284 = vrot.lane.b32.xlu1 %v5071_v56, %s4638_s13 }
 0xd3c   :  { %v2702_v40 = vpop.xlane.xlu0 %2701 }
 0xd3d   :  { %4576 = vrcp.f32 %v2702_v40 }
 0xd44   :  { %v2708_v46 = vpop.xlane.xlu0 %2707 }
 0xd45   :  { %4578 = vrcp.f32 %v2708_v46 }
 0xd4a   :  { %v4577_v48 = vpop.eup %4576 }
 0xd4b   :  { %v2724_v49 = vmul.f32 %v4577_v48, %v4561_v5 }
 0xd4c   :  { %v2714_v20 = vpop.xlane.xlu0 %2713 }
 0xd4d   :  { %4580 = vrcp.f32 %v2714_v20  ;;  %v2717_v53 = vpop.xlane.xlu1 %2716  ;;  %4393 = vmatmul.mubr.msk.f32.vlgmr.msra.gmra.mxu1 %vm215_vm2, %v2724_v49 }
 0xd4e   :  { %4401 = vmatpush3.msra.mxu1 %v2966_v45  ;;  %4402 = vmatprep.mubr.msk.f32.mxu1 %vm4627_vm1, %v4626_v18 }
 0xd4f   :  { %4410 = vmatprep.subr.mxu1 %v4626_v18 }
 0xd51   :  { %v2699_v56 = vpop.xlane.xlu1 %2698  ;;  %v2720_v54 = vpop.xlane.xlu0 %2719 }
 0xd52   :  { %v4579_v57 = vpop.eup %4578  ;;  %4582 = vrcp.f32 %v2699_v56 }
 0xd53   :  { %4584 = vrcp.f32 %v2720_v54  ;;  %v2728_v58 = vmul.f32 %v4579_v57, %v4563_v24  ;;  %v3992_v24 = vld [vmem:[%s5364_s2 + $0x30] sm:$0xff]  ;;  %v3383_v54 = vrot.slane %v5053_v52, %v1577_v61 }
 0xd55   :  { %v2705_v60 = vpop.xlane.xlu1 %2704  ;;  %4403 = vmatmul.mubr.msk.f32.vlgmr.msra.gmra.mxu1 %vm215_vm2, %v2728_v58  ;;  %v3209_v11 = vpop.permute.xlu0 %3208 }
 0xd56   :  { %4586 = vrcp.f32 %v2705_v60  ;;  %4411 = vmatpush3.msra.mxu1 %v3133_v47  ;;  %4412 = vmatprep.mubr.msk.f32.mxu1 %vm4627_vm1, %v4626_v18 }
 0xd57   :  { %4420 = vmatprep.subr.mxu1 %v4626_v18 }
 0xd59   :  { %v2711_v62 = vpop.xlane.xlu1 %2710 }
 0xd5a   :  { %v4581_v63 = vpop.eup %4580  ;;  %4588 = vrcp.f32 %v2711_v62 }
 0xd5b   :  { %v2732_v0 = vmul.f32 %v4581_v63, %v4565_v25  ;;  %4590 = vrcp.f32 %v2717_v53 }
 0xd5d   :  { %v3285_v1 = vpop.permute.xlu1 %3284  ;;  %4413 = vmatmul.mubr.msk.f32.vlgmr.msra.gmra.mxu1 %vm215_vm2, %v2732_v0 }
 0xd5e   :  { %4421 = vmatpush3.msra.mxu1 %v3285_v1  ;;  %4422 = vmatprep.mubr.msk.f32.mxu1 %vm4627_vm1, %v4626_v18 }
 0xd5f   :  { %v4583_v55 = vpop.eup %4582 }
 0xd60   :  { %v4585_v2 = vpop.eup %4584  ;;  %v2722_v3 = vmul.f32 %v4583_v55, %v4569_v30 }
 0xd61   :  { %v2736_v23 = vmul.f32 %v4585_v2, %v4571_v31 }
 0xd62   :  { %4388 = vmatmul.mubr.msk.f32.vlgmr.msra.gmra.mxu0 %vm215_vm2, %v2722_v3 }
 0xd63   :  { %v4587_v5 = vpop.eup %4586  ;;  %4396 = vmatpush3.msra.mxu0 %v2890_v42  ;;  %4423 = vmatmul.mubr.msk.f32.vlgmr.msra.gmra.mxu1 %vm215_vm2, %v2736_v23 }
 0xd64   :  { %4397 = vmatprep.mubr.msk.f32.mxu0 %vm4627_vm1, %v4626_v18  ;;  %4405 = vmatprep.subr.mxu0 %v4626_v18  ;;  %v2726_v6 = vmul.f32 %v4587_v5, %v4573_v34 }
 0xd66   :  { %4398 = vmatmul.mubr.msk.f32.vlgmr.msra.gmra.mxu0 %vm215_vm2, %v2726_v6 }
 0xd67   :  { %v4589_v7 = vpop.eup %4588  ;;  %4406 = vmatpush3.msra.mxu0 %v3057_v39  ;;  %4407 = vmatprep.mubr.msk.f32.mxu0 %vm4627_vm1, %v4626_v18 }
 0xd68   :  { %4415 = vmatprep.subr.mxu0 %v4626_v18  ;;  %v2730_v8 = vmul.f32 %v4589_v7, %v4575_v36  ;;  %v4591_v9 = vpop.eup %4590 }
 0xd69   :  { %v2734_v12 = vmul.f32 %v4591_v9, %v5167_v27  ;;  %v3990_v27 = vld [vmem:[%s5364_s2 + $0x20] sm:$0xff]  ;;  %v3999_v9 = vld [vmem:[%s5365_s3 + $0x38] sm:$0xff] }
 0xd6a   :  { %4408 = vmatmul.mubr.msk.f32.vlgmr.msra.gmra.mxu0 %vm215_vm2, %v2730_v8  ;;  %4436 = vmatprep.subr.mxu1 %v3999_v9 }
 0xd6b   :  { %4416 = vmatpush3.msra.mxu0 %v3209_v11  ;;  %4417 = vmatprep.mubr.msk.f32.mxu0 %vm4627_vm1, %v4626_v18  ;;  %v3998_v11 = vld [vmem:[%s5365_s3 + $0x30] sm:$0xff] }
 0xd6c   :  { %4425 = vmatprep.subr.mxu0 %v3993_v16  ;;  %4437 = vmatpush3.msra.mxu1 %v3999_v9 }
 0xd6d   :  { %4438 = vmatprep.subr.mxu1 %v3998_v11 }
 0xd6e   :  { %4418 = vmatmul.mubr.msk.f32.vlgmr.msra.gmra.mxu0 %vm215_vm2, %v2734_v12  ;;  %v3997_v12 = vld [vmem:[%s5365_s3 + $0x28] sm:$0xff]  ;;  %4439 = vmatpush3.msra.mxu1 %v3998_v11 }
 0xd6f   :  { %4426 = vmatpush3.msra.mxu0 %v3993_v16  ;;  %4440 = vmatprep.subr.mxu1 %v3997_v12  ;;  %v4014_v16 = vld [vmem:[%s5366_s4 + $0xe0] sm:$0xff] }
 0xd70   :  { %4427 = vmatprep.subr.mxu0 %v3992_v24  ;;  %4441 = vmatpush3.msra.mxu1 %v3997_v12 }
 0xd71   :  { %4428 = vmatpush3.msra.mxu0 %v3992_v24  ;;  %v4012_v24 = vld [vmem:[%s5366_s4 + $0xd0] sm:$0xff] }
 0xd72   :  { %4429 = vmatprep.subr.mxu0 %v3991_v26 }
 0xd73   :  { %4430 = vmatpush3.msra.mxu0 %v3991_v26  ;;  %v4010_v26 = vld [vmem:[%s5366_s4 + $0xc0] sm:$0xff] }
 0xd74   :  { %4431 = vmatprep.subr.mxu0 %v3990_v27 }
 0xd75   :  { %4432 = vmatpush3.msra.mxu0 %v3990_v27  ;;  %v4008_v27 = vld [vmem:[%s5366_s4 + $0xb0] sm:$0xff] }
 0xe0d   :  { %v2885_v15 = vpop.f32.mrf.mxu1 }
 0xe0e   :  { %3042 = vrot.lane.b32.xlu0 %v2885_v15, %s4639_s19  ;;  %v3996_v15 = vld [vmem:[%s5365_s3 + $0x20] sm:$0xff] }
 0xe0f   :  { %v4394_v14 = vpop.f32.mrf.mxu1  ;;  %4442 = vmatprep.subr.mxu1 %v3996_v15 }
 0xe10   :  { %4443 = vmatpush3.msra.mxu1 %v3996_v15  ;;  %v4017_v14 = vld [vmem:[%s5366_s4 + $0xf8] sm:$0xff] }
 0xe11   :  { %4447 = vmatprep.subr.mxu0 %v4017_v14 }
 0xe15   :  { %v3037_v10 = vpop.f32.mrf.mxu1 }
 0xe17   :  { %v4404_v13 = vpop.f32.mrf.mxu1 }
 0xe18   :  { %v4015_v13 = vld [vmem:[%s5366_s4 + $0xe8] sm:$0xff] }
 0xe1d   :  { %v3204_v21 = vpop.f32.mrf.mxu1 }
 0xe1e   :  { %3361 = vrot.lane.b32.xlu0 %v3204_v21, %s4639_s19  ;;  %v4013_v21 = vld [vmem:[%s5366_s4 + $0xd8] sm:$0xff] }
 0xe1f   :  { %v4414_v22 = vpop.f32.mrf.mxu1 }
 0xe20   :  { %v4011_v22 = vld [vmem:[%s5366_s4 + $0xc8] sm:$0xff] }
 0xe22   :  { %v2809_v25 = vpop.f32.mrf.mxu0 }
 0xe23   :  { %v3356_v28 = vpop.f32.mrf.mxu1 }
 0xe24   :  { %v4389_v29 = vpop.f32.mrf.mxu0 }
 0xe25   :  { %v4424_v30 = vpop.f32.mrf.mxu1  ;;  %v4006_v29 = vld [vmem:[%s5366_s4 + $0xa0] sm:$0xff] }
 0xe26   :  { %v2961_v31 = vpop.f32.mrf.mxu0 }
 0xe27   :  { %3046 = vrot.lane.b32.xlu1 %v2961_v31, %s4640_s20 }
 0xe28   :  { %v4399_v32 = vpop.f32.mrf.mxu0 }
 0xe2a   :  { %v3128_v33 = vpop.f32.mrf.mxu0 }
 0xe2b   :  { %3050 = vrot.lane.b32.xlu1 %v3037_v10, %s4641_s23  ;;  %v4016_v10 = vld [vmem:[%s5366_s4 + $0xf0] sm:$0xff] }
 0xe2c   :  { %v4409_v34 = vpop.f32.mrf.mxu0 }
 0xe2e   :  { %v3280_v35 = vpop.f32.mrf.mxu0 }
 0xe2f   :  { %3365 = vrot.lane.b32.xlu0 %v3280_v35, %s4640_s20  ;;  %3369 = vrot.lane.b32.xlu1 %v3356_v28, %s4641_s23  ;;  %v4007_v28 = vld [vmem:[%s5366_s4 + $0xa8] sm:$0xff] }
 0xe30   :  { %v4419_v36 = vpop.f32.mrf.mxu0 }
 0xe31   :  { %v3496_v36 = vrot.slane %v5053_v52, %v1691_v43  ;;  %v4005_v43 = vld [vmem:[%s5366_s4 + $0x98] sm:$0xff] }
 0xe80   :  { %v3043_v37 = vpop.permute.xlu0 %3042 }
 0xe81   :  { %v3053_v40 = vsel %vm215_vm2, %v2809_v25, %v3043_v37  ;;  %v4009_v25 = vld [vmem:[%s5366_s4 + $0xb8] sm:$0xff] }
 0xe90   :  { %v3362_v42 = vpop.permute.xlu0 %3361 }
 0xe91   :  { %v3372_v48 = vsel %vm215_vm2, %v3128_v33, %v3362_v42 }
 0xe99   :  { %v3047_v39 = vpop.permute.xlu1 %3046 }
 0xe9a   :  { %v3054_v45 = vsel %vm1248_vm3, %v3053_v40, %v3047_v39  ;;  %v3502_v40 = vrot.slane %v5053_v52, %v1697_v44  ;;  %v4004_v44 = vld [vmem:[%s5366_s4 + $0x90] sm:$0xff] }
 0xe9d   :  { %v3051_v46 = vpop.permute.xlu1 %3050 }
 0xe9e   :  { %v3055_v47 = vsel %vm1250_vm4, %v3054_v45, %v3051_v46 }
 0xe9f   :  { %4433 = vmatprep.mubr.msk.f32.mxu0 %vm40_vm0, %v3055_v47 }
 0xea1   :  { %v3366_v49 = vpop.permute.xlu0 %3365  ;;  %v3370_v20 = vpop.permute.xlu1 %3369 }
 0xea2   :  { %v3373_v53 = vsel %vm1248_vm3, %v3372_v48, %v3366_v49 }
 0xea3   :  { %v3374_v56 = vsel %vm1250_vm4, %v3373_v53, %v3370_v20  ;;  %v4003_v20 = vld [vmem:[%s5366_s4 + $0x88] sm:$0xff]  ;;  %v4002_v53 = vld [vmem:[%s5366_s4 + $0x80] sm:$0xff] }
 0xea4   :  { %4434 = vmatmul.mubr.msk.f32.vlgmr.msra.gmra.mxu0 %vm40_vm0, %v3374_v56  ;;  %v3513_v56 = vrot.slane %v5053_v52, %v1707_v59 }
 0xea5   :  { %4448 = vmatpush3.msra.mxu0 %v4017_v14  ;;  %v36_v14 = vld [vmem:[%s5368_s6 + $0x48] sm:$0xff] }
 0xea6   :  { %4449 = vmatprep.subr.mxu0 %v4016_v10  ;;  %4482 = vmatprep.subr.mxu1 %v36_v14 }
 0xea7   :  { %4450 = vmatpush3.msra.mxu0 %v4016_v10  ;;  %v35_v10 = vld [vmem:[%s5368_s6 + $0x40] sm:$0xff] }
 0xea8   :  { %4451 = vmatprep.subr.mxu0 %v4015_v13 }
 0xea9   :  { %4452 = vmatpush3.msra.mxu0 %v4015_v13  ;;  %v34_v13 = vld [vmem:[%s5368_s6 + $0x38] sm:$0xff] }
 0xeaa   :  { %4453 = vmatprep.subr.mxu0 %v4014_v16 }
 0xeab   :  { %4454 = vmatpush3.msra.mxu0 %v4014_v16  ;;  %v33_v16 = vld [vmem:[%s5368_s6 + $0x30] sm:$0xff] }
 0xeac   :  { %4455 = vmatprep.subr.mxu0 %v4013_v21 }
 0xead   :  { %4456 = vmatpush3.msra.mxu0 %v4013_v21 }
 0xeae   :  { %4457 = vmatprep.subr.mxu0 %v4012_v24 }
 0xeaf   :  { %4458 = vmatpush3.msra.mxu0 %v4012_v24 }
 0xeb0   :  { %4459 = vmatprep.subr.mxu0 %v4011_v22 }
 0xeb1   :  { %4460 = vmatpush3.msra.mxu0 %v4011_v22 }
 0xeb2   :  { %4461 = vmatprep.subr.mxu0 %v4010_v26 }
 0xeb3   :  { %4462 = vmatpush3.msra.mxu0 %v4010_v26 }
 0xeb4   :  { %4463 = vmatprep.subr.mxu0 %v4009_v25 }
 0xeb5   :  { %4464 = vmatpush3.msra.mxu0 %v4009_v25 }
 0xeb6   :  { %4465 = vmatprep.subr.mxu0 %v4008_v27 }
 0xeb7   :  { %4466 = vmatpush3.msra.mxu0 %v4008_v27 }
 0xeb8   :  { %4467 = vmatprep.subr.mxu0 %v4007_v28 }
 0xeb9   :  { %4468 = vmatpush3.msra.mxu0 %v4007_v28 }
 0xeba   :  { %4469 = vmatprep.subr.mxu0 %v4006_v29 }
 0xebb   :  { %4470 = vmatpush3.msra.mxu0 %v4006_v29  ;;  %v3724_v29 = vrot.slane %v5053_v52, %v1917_v38  ;;  %v37_v38 = vld [vmem:[%s5368_s6 + $0x50] sm:$0xff]  ;;  %s4643_s6 = smov [#allocation2]  }
 0xebc   :  { %4471 = vmatprep.subr.mxu0 %v4005_v43  ;;  %v3736_v17 = vrot.slane %v37_v38, %v4735_v19  ;;  %s3919_s26 = sshll.u32 %s4643_s6, 4  ;;  %s3920_s26 = int_to_ptr.vmem [resolvable:$true] %s3919_s26 }
 0xebd   :  { %4472 = vmatpush3.msra.mxu0 %v4005_v43  ;;  %s4604_s27 = scalar_lea.vmem %s3920_s26, 16  ;;  %s4608_s28 = scalar_lea.vmem %s3920_s26, 32 }
 0xebe   :  { %4473 = vmatprep.subr.mxu0 %v4004_v44  ;;  %p4605_p0 = scmp.ne.s32.totalorder %s3920_s26, %s4604_s27  ;;  %p4609_p1 = scmp.lt.s32.totalorder %s3920_s26, %s3920_s26 }
 0xebf   :  { %4474 = vmatpush3.msra.mxu0 %v4004_v44  ;;  %p4610_p2 = scmp.lt.s32.totalorder %s4608_s28, %s4604_s27 }
 0xec0   :  { %4475 = vmatprep.subr.mxu0 %v4003_v20 }
 0xec1   :  { %4476 = vmatpush3.msra.mxu0 %v4003_v20  ;;  %p4611_p3 = por %p4610_p2, %p4609_p1 }
 0xec2   :  { %4477 = vmatprep.subr.mxu0 %v4002_v53 }
 0xec3   :  { %4478 = vmatpush3.msra.mxu0 %v4002_v53  ;;  %p4612_p4 = pnand %p4611_p3, %p4605_p0 }
 0xf64   :  { %v4435_v57 = vpop.f32.mrf.mxu0 }
 0xf65   :  { %v3462_v58 = vadd.f32 %v4435_v57, %v3383_v54 }
 0xf66   :  { %v3456_v60 = vpop.f32.mrf.mxu0 }
 0xf67   :  { %v3457_v62 = vadd.f32 %v3456_v60, %v3383_v54  ;;  %v3466_v63 = vadd.f32 %v3462_v58, %v5042_v51 }
 0xf69   :  { %v3470_v0 = vsel %vm40_vm0, %v3466_v63, 0.0  ;;  %v3465_v1 = vadd.f32 %v3457_v62, %v5040_v50 }
 0xf6a   :  { %3471 = vadd.xlane.f32.xlu1 %v3470_v0  ;;  %v3617_v0 = vrot.slane %v5053_v52, %v1810_v4 }
 0xf6b   :  { %v3467_v55 = vsel %vm40_vm0, %v3465_v1, 0.0 }
 0xf6c   :  { %3468 = vadd.xlane.f32.xlu0 %v3467_v55 }
 0xff3   :  { %v3472_v2 = vpop.xlane.xlu1 %3471 }
 0xff4   :  { %v3474_v3 = vmul.f32 0.03125, %v3472_v2 }
 0xff5   :  { %v3469_v23 = vpop.xlane.xlu0 %3468 }
 0xff6   :  { %v3473_v5 = vmul.f32 0.03125, %v3469_v23  ;;  %v5238_v6 = vsub.f32 %v3466_v63, %v3474_v3 }
 0xff8   :  { %v5240_v61 = vsub.f32 %v3465_v1, %v3473_v5  ;;  %v3478_v50 = vmul.f32 %v5238_v6, %v5238_v6 }
 0xffa   :  { %v3477_v7 = vmul.f32 %v5240_v61, %v5240_v61  ;;  %v3482_v8 = vsel %vm40_vm0, %v3478_v50, 0.0 }
 0xffc   :  { %v3479_v51 = vsel %vm40_vm0, %v3477_v7, 0.0 }
 0xffd   :  { %3480 = vadd.xlane.f32.xlu0 %v3479_v51 }
0x1001   :  { %3483 = vadd.xlane.f32.xlu0 %v3482_v8 }
0x1086   :  { %v3481_v30 = vpop.xlane.xlu0 %3480 }
0x1087   :  { %v3485_v31 = vmul.f32 0.03125, %v3481_v30 }
0x1089   :  { %v3487_v32 = vadd.f32 1e-05, %v3485_v31 }
0x108a   :  { %v3484_v33 = vpop.xlane.xlu0 %3483 }
0x108b   :  { %4592 = vrsqrt.f32 %v3487_v32  ;;  %v3486_v34 = vmul.f32 0.03125, %v3484_v33 }
0x108d   :  { %v3488_v35 = vadd.f32 1e-05, %v3486_v34  ;;  %v3730_v34 = vrot.slane %v5053_v52, %v1923_v41 }
0x108f   :  { %4594 = vrsqrt.f32 %v3488_v35 }
0x1098   :  { %v4593_v37 = vpop.eup %4592 }
0x1099   :  { %v3491_v39 = vmul.f32 %v4593_v37, %v5240_v61 }
0x109b   :  { %v3497_v42 = vmul.f32 %v3496_v36, %v3491_v39  ;;  %v4642_v39 = vmov 0  }
0x109c   :  { %v4595_v45 = vpop.eup %4594  ;;  %4518 = vset.pattern.permute.xlu1 %v4642_v39  ;;  %4519 = vset.pattern.permute.xlu0 %v4642_v39 }
0x109d   :  { %v3492_v46 = vmul.f32 %v4595_v45, %v5238_v6  ;;  %v3503_v47 = vadd.f32 %v3502_v40, %v3497_v42 }
0x109f   :  { %v3498_v48 = vmul.f32 %v3496_v36, %v3492_v46  ;;  %4444 = vmatprep.mubr.msk.f32.mxu1 %vm40_vm0, %v3503_v47 }
0x10a1   :  { %v3504_v49 = vadd.f32 %v3502_v40, %v3498_v48 }
0x10a3   :  { %4445 = vmatmul.mubr.msk.f32.vlgmr.msra.gmra.mxu1 %vm40_vm0, %v3504_v49 }
0x10a4   :  { %4483 = vmatpush3.msra.mxu1 %v36_v14 }
0x10a5   :  { %4484 = vmatprep.subr.mxu1 %v35_v10 }
0x10a6   :  { %4485 = vmatpush3.msra.mxu1 %v35_v10 }
0x10a7   :  { %4486 = vmatprep.subr.mxu1 %v34_v13 }
0x10a8   :  { %4487 = vmatpush3.msra.mxu1 %v34_v13 }
0x10a9   :  { %4488 = vmatprep.subr.mxu1 %v33_v16 }
0x10aa   :  { %4489 = vmatpush3.msra.mxu1 %v33_v16 }
0x10ab   :  { %4493 = vmatprep.subr.mxu1 %v4626_v18 }
0x1163   :  { %v4446_v54 = vpop.f32.mrf.mxu1 }
0x1164   :  { %v3592_v57 = vadd.f32 %v4446_v54, %v3513_v56 }
0x1165   :  { %v3586_v58 = vpop.f32.mrf.mxu1 }
0x1166   :  { %v3587_v60 = vadd.f32 %v3586_v58, %v3513_v56  ;;  %v3596_v63 = vmax.f32 %v3592_v57, 0.0 }
0x1168   :  { %v3595_v62 = vmax.f32 %v3587_v60, 0.0 }
0x116a   :  { %4479 = vmatprep.mubr.f32.mxu0 %v3595_v62 }
0x116b   :  { %4480 = vmatmul.mubr.f32.vlgmr.msra.gmra.mxu0 %v3596_v63 }
0x122b   :  { %v4481_v1 = vpop.f32.mrf.mxu0 }
0x122c   :  { %v3690_v55 = vadd.f32 %v4481_v1, %v3617_v0 }
0x122d   :  { %v3684_v2 = vpop.f32.mrf.mxu0 }
0x122e   :  { %v3694_v3 = vadd.f32 %v3690_v55, %v3504_v49  ;;  %v3685_v23 = vadd.f32 %v3684_v2, %v3617_v0 }
0x1230   :  { %v3693_v5 = vadd.f32 %v3685_v23, %v3503_v47  ;;  %v3698_v59 = vsel %vm40_vm0, %v3694_v3, 0.0  ;;  %v3824_v47 = vrot.slane %v37_v38, 1 }
0x1231   :  { %3699 = vadd.xlane.f32.xlu0 %v3698_v59 }
0x1232   :  { %v3695_v6 = vsel %vm40_vm0, %v3693_v5, 0.0 }
0x1233   :  { %3696 = vadd.xlane.f32.xlu1 %v3695_v6 }
0x12ba   :  { %v3700_v61 = vpop.xlane.xlu0 %3699 }
0x12bb   :  { %v3702_v7 = vmul.f32 0.03125, %v3700_v61 }
0x12bc   :  { %v3697_v51 = vpop.xlane.xlu1 %3696 }
0x12bd   :  { %v3704_v50 = vsub.f32 %v3694_v3, %v3702_v7  ;;  %v3701_v8 = vmul.f32 0.03125, %v3697_v51 }
0x12bf   :  { %v3703_v9 = vsub.f32 %v3693_v5, %v3701_v8  ;;  %v3706_v11 = vmul.f32 %v3704_v50, %v3704_v50 }
0x12c1   :  { %v3710_v4 = vsel %vm40_vm0, %v3706_v11, 0.0  ;;  %v3705_v12 = vmul.f32 %v3703_v9, %v3703_v9 }
0x12c2   :  { %3711 = vadd.xlane.f32.xlu0 %v3710_v4 }
0x12c3   :  { %v3707_v15 = vsel %vm40_vm0, %v3705_v12, 0.0 }
0x12c4   :  { %3708 = vadd.xlane.f32.xlu1 %v3707_v15 }
0x12d5   :  { %3822 = vperm.xlu1 %4518, %v37_v38  }
0x134b   :  { %v3712_v21 = vpop.xlane.xlu0 %3711 }
0x134c   :  { %v3714_v24 = vmul.f32 0.03125, %v3712_v21 }
0x134d   :  { %v3709_v22 = vpop.xlane.xlu1 %3708 }
0x134e   :  { %v3716_v26 = vadd.f32 1e-05, %v3714_v24  ;;  %v3713_v25 = vmul.f32 0.03125, %v3709_v22 }
0x1350   :  { %4596 = vrsqrt.f32 %v3716_v26  ;;  %v3715_v27 = vadd.f32 1e-05, %v3713_v25 }
0x1351   :  { %v3823_v48 = vpop.permute.xlu1 %3822 }
0x1352   :  { %4598 = vrsqrt.f32 %v3715_v27  ;;  %v3825_v49 = vrot.slane %v3823_v48, 2 }
0x135d   :  { %v4597_v28 = vpop.eup %4596 }
0x135e   :  { %v3720_v30 = vmul.f32 %v4597_v28, %v3704_v50 }
0x135f   :  { %v4599_v31 = vpop.eup %4598 }
0x1360   :  { %v3719_v32 = vmul.f32 %v4599_v31, %v3703_v9  ;;  %v3726_v33 = vmul.f32 %v3724_v29, %v3720_v30 }
0x1362   :  { %v3725_v35 = vmul.f32 %v3724_v29, %v3719_v32  ;;  %v3732_v37 = vadd.f32 %v3730_v34, %v3726_v33 }
0x1364   :  { %v3731_v36 = vadd.f32 %v3730_v34, %v3725_v35 }
0x1366   :  { %4490 = vmatprep.mubr.msk.f32.mxu1 %vm40_vm0, %v3731_v36 }
0x1367   :  { %4491 = vmatmul.mubr.msk.f32.vlgmr.msra.gmra.mxu1 %vm40_vm0, %v3732_v37 }
0x1368   :  { %4497 = vmatprep.mubr.msk.f32.mxu1 %vm4627_vm1, %v4626_v18 }
0x1427   :  { %v4492_v41 = vpop.f32.mrf.mxu1 }
0x1428   :  { %v3815_v52 = vadd.f32 %v4492_v41, %v3736_v17 }
0x1429   :  { %v3809_v40 = vpop.f32.mrf.mxu1 }
0x142a   :  { %v3819_v42 = vmax.f32 %v3815_v52, 0.0  ;;  %v3810_v45 = vadd.f32 %v3809_v40, %v3736_v17 }
0x142c   :  { %4494 = vmatpush3.xpose.msk.msra.mxu1 %vm1248_vm3, %v3819_v42  ;;  %v3818_v46 = vmax.f32 %v3810_v45, 0.0 }
0x142d   :  { %4495 = vmatprep.subr.mxu1 %v4626_v18 }
0x1430   :  { %4496 = vmatpush3.xpose.msk.msra.mxu1 %vm1248_vm3, %v3818_v46 }
0x1433   :  { %4498 = vmatmul.mubr.msk.f32.vlgmr.msra.gmra.mxu1 %vm1248_vm3, %v3824_v47 }
0x14f3   :  { %v3901_v43 = vpop.f32.mrf.mxu1 }
0x14f4   :  { %v3902_v44 = vadd.f32 %v3901_v43, %v3825_v49 }
0x14f5   :  { %v4499_v19 = vpop.f32.mrf.mxu1 }
0x14f6   :  { %v4023_v20 = vmul.f32 -1.442695, %v3902_v44 }
0x14f8   :  { %4600 = vpow2.f32 %v4023_v20 }
0x1505   :  { %v4601_v53 = vpop.eup %4600 }
0x1506   :  { %v3908_v56 = vadd.f32 1.0, %v4601_v53 }
0x1508   :  { %4602 = vrcp.f32 %v3908_v56 }
0x1515   :  { %v4603_v18 = vpop.eup %4602 }
0x1516   :  { %3912 = vst.msk [vmem:[#allocation2] sm:$0x1] %vm3911_vm5, %v4603_v18 }
0x1517   :  { %4615 = shalt.err (!%p4612_p4)
}
0x1518   :  { %3922 = dma.vmem_to_hbm [thread:$0]  %s3920_s26, 16, %s5369_s7, [#allocation3]  }
0x1519   :  { %4624 = dma.done.wait [#allocation3], 16  }
0x151a   :  { %4625 = vsyncadd [#allocation3], 4294967280 }
0x151b   :  { %3926 = vsyncpa [#allocation3], 1 }

</bundles_post_ra>
